<compile_context>
chip_gen: v7x
topology: tpu7x:2x2x1
jax: 0.10.0
libtpu: 0.0.40
codegen_flags: <defaults>
</compile_context>

<pallas_src>
import functools

import jax
import jax.numpy as jnp
from jax.experimental import pallas as pl
from jax.experimental.pallas import tpu as pltpu

L2_WEIGHT = 1.0
LPIPS_WEIGHT = 0.8
FACE_WEIGHT = 0.1
EPS_NORM = 1e-10
EPS_COS = 1e-8

_MIB = 1024 * 1024


def _round_up(x, m):
    return (x + m - 1) // m * m


def _tpu_generation():
    """Best-effort TPU generation (5/6/7) from the device kind string."""
    try:
        kind = jax.devices()[0].device_kind.lower()
    except Exception:
        return 6
    for gen in (7, 6, 5, 4):
        if f"v{gen}" in kind:
            return gen
    return 6


def _vmem_capacity_bytes(gen):
    """Physical VMEM per core; query the runtime, fall back to known capacities."""
    try:
        cap = int(getattr(pltpu.get_tpu_info(), "vmem_capacity_bytes", 0))
        if cap >= 16 * _MIB:
            return cap
    except Exception:
        pass
    return (64 if gen >= 7 else 128) * _MIB


def _imsim_tile_kernel(a_ref, b_ref, wf_ref, wlp_ref, wemb_ref,
                       sums_ref, ea_ref, eb_ref, *, n_batch, n_chan, lpips_bf16):
    a_t = a_ref[...]                                    # (N, C, T) f32, lane-dense
    b_t = b_ref[...]

    # ---------------- L2 / MSE partial (exact, f32) ----------------
    d = a_t - b_t
    l2_part = jnp.sum(d * d)

    # bf16 copies feed the MXU face path (and the LPIPS VPU path on v6e/v7x).
    a_h = a_t.astype(jnp.bfloat16)
    b_h = b_t.astype(jnp.bfloat16)

    # ----- LPIPS 1x1-conv features via per-channel VPU FMAs (keeps MXU free) -----
    feat_dt = jnp.bfloat16 if lpips_bf16 else jnp.float32
    wf = wf_ref[...].astype(feat_dt)                    # (C, F, 1)
    a_f = a_h if lpips_bf16 else a_t
    b_f = b_h if lpips_bf16 else b_t
    fa = a_f[:, 0:1, :] * wf[0][None]                   # (N,1,T)*(1,F,1) -> (N,F,T)
    fb = b_f[:, 0:1, :] * wf[0][None]
    for c in range(1, n_chan):
        fa = fa + a_f[:, c:c + 1, :] * wf[c][None]
        fb = fb + b_f[:, c:c + 1, :] * wf[c][None]

    # channel-unit-normalize: x / (sqrt(sum x^2) + eps)  (LPIPS normalize_tensor).
    # Norm + final reductions accumulate in f32; reciprocal of the tiny (N,1,T)
    # tensors goes to the EUP (approx=True, eps-guarded).
    ssa = jnp.sum(fa * fa, axis=1, keepdims=True, dtype=jnp.float32)
    ssb = jnp.sum(fb * fb, axis=1, keepdims=True, dtype=jnp.float32)
    inv_a = pl.reciprocal(jnp.sqrt(ssa) + EPS_NORM, approx=True).astype(feat_dt)
    inv_b = pl.reciprocal(jnp.sqrt(ssb) + EPS_NORM, approx=True).astype(feat_dt)
    fd = fa * inv_a - fb * inv_b                        # (N, F, T)
    wfd = fd * fd * wlp_ref[...][None].astype(feat_dt)  # w_lp broadcast as (1, F, 1)
    lpips_part = jnp.sum(wfd, dtype=jnp.float32)

    # ----- face-embedding partials: one shared-RHS bf16 MXU dot per channel -----
    n_emb = wemb_ref.shape[-1]
    ab = jnp.concatenate([a_h, b_h], axis=0)            # (2N, C, T) bf16
    acc = jnp.zeros((2 * n_batch, n_emb), jnp.float32)
    for c in range(n_chan):
        acc = acc + jnp.dot(ab[:, c, :], wemb_ref[c],   # (2N,T) @ (T,E), f32 acc
                            preferred_element_type=jnp.float32)
    ea_ref[0] = acc[:n_batch]
    eb_ref[0] = acc[n_batch:]

    # pack the two scalar partials into a lane-dense (1, 1, 128) row
    lane = jax.lax.broadcasted_iota(jnp.int32, (1, 1, 128), 2)
    sums_ref[...] = jnp.where(lane == 0, l2_part,
                              jnp.where(lane == 1, lpips_part, 0.0))


def _step_bytes(tile, n, c, f, e):
    """Conservative, padding-aware per-grid-step VMEM working-set estimate."""
    c_pad = _round_up(c, 8)
    n_pad = _round_up(n, 8)
    n2_pad = _round_up(2 * n, 8)
    img = 2 * 2 * n * c_pad * tile * 4              # a,b f32 tiles (3->8 sublane pad), x2 buffers
    wemb = 2 * c * tile * e * 2                     # bf16 w_emb tile, double-buffered
    wres = 2 * (c * f * 128 + f * 128) * 4          # resident w_feat/w_lp (lane-padded)
    outs = 2 * (8 * 128 + 2 * n_pad * e) * 4        # sums + ea/eb output blocks, x2 buffers
    inter = 6 * n * f * tile * 4                    # fa/fb/fd + temps (counted as f32)
    inter += 2 * 2 * n * c_pad * tile * 2 + n2_pad * e * 4   # bf16 copies/concat + acc
    return img + wemb + wres + outs + inter


def _pick_tile_hw(hw, n, c, f, e, budget_bytes):
    """Largest 128-multiple divisor of hw whose padded working set fits the budget.
    Prefers >= 2 grid steps (pipelining) and an even step count (v7x megacore)."""
    cands = [t for t in range(128, hw + 1, 128) if hw % t == 0]
    fitting = [t for t in cands if _step_bytes(t, n, c, f, e) <= budget_bytes]
    if not fitting:
        fitting = [cands[0]]
    for want_multi, want_even in ((True, True), (True, False), (False, False)):
        sel = [t for t in fitting
               if (not want_multi or hw // t >= 2)
               and (not want_even or (hw // t) % 2 == 0)]
        if sel:
            return max(sel)
    return max(fitting)


def face_imsim_loss(a, b, w_feat, w_lp, w_emb,
                    l2_weight=L2_WEIGHT, lpips_weight=LPIPS_WEIGHT,
                    face_weight=FACE_WEIGHT, lpips_bf16=None):
    """a, b: (N, C, H, W) float32 images.  w_feat: (C, F) 1x1-conv LPIPS features,
    w_lp: (F,) LPIPS lin weights, w_emb: (C*H*W, E) face-embedding matrix (ideally
    already stored as bf16).  Returns a scalar loss."""
    n, c, h, w = a.shape
    hw = h * w
    cf, f = w_feat.shape
    d_flat, e = w_emb.shape
    assert cf == c and d_flat == c * hw
    assert hw % 128 == 0 and f % 128 == 0 and e % 128 == 0

    gen = _tpu_generation()
    if lpips_bf16 is None:
        lpips_bf16 = gen >= 6          # v5e has no bf16 VALU; keep its LPIPS path f32

    vmem_cap = _vmem_capacity_bytes(gen)
    budget = min(int(vmem_cap * 0.7), 96 * _MIB)
    tile = _pick_tile_hw(hw, n, c, f, e, budget)
    num_tiles = hw // tile
    vmem_limit = int(max(32 * _MIB,
                         min(_step_bytes(tile, n, c, f, e) + 16 * _MIB,
                             vmem_cap - 8 * _MIB, 120 * _MIB)))

    # Free reshapes only: no host transpose, no channel pad, single image stream.
    a_img = a.reshape(n, c, hw)
    b_img = b.reshape(n, c, hw)
    w_feat_k = w_feat.reshape(c, f, 1)            # per-channel feature columns
    w_lp_k = w_lp.reshape(f, 1)
    # Dominant HBM stream -> bf16 (no-op convert if the caller already stores bf16).
    w_emb_k = w_emb.reshape(c, hw, e).astype(jnp.bfloat16)

    kernel = functools.partial(_imsim_tile_kernel, n_batch=n, n_chan=c,
                               lpips_bf16=bool(lpips_bf16))

    sums, ea_p, eb_p = pl.pallas_call(
        kernel,
        grid=(num_tiles,),
        in_specs=[
            pl.BlockSpec((n, c, tile), lambda i: (0, 0, i)),
            pl.BlockSpec((n, c, tile), lambda i: (0, 0, i)),
            pl.BlockSpec((c, f, 1), lambda i: (0, 0, 0)),   # resident across grid
            pl.BlockSpec((f, 1), lambda i: (0, 0)),         # resident across grid
            pl.BlockSpec((c, tile, e), lambda i: (0, i, 0)),
        ],
        out_specs=(
            pl.BlockSpec((1, 1, 128), lambda i: (i, 0, 0)),
            pl.BlockSpec((1, n, e), lambda i: (i, 0, 0)),
            pl.BlockSpec((1, n, e), lambda i: (i, 0, 0)),
        ),
        out_shape=(
            jax.ShapeDtypeStruct((num_tiles, 1, 128), jnp.float32),
            jax.ShapeDtypeStruct((num_tiles, n, e), jnp.float32),
            jax.ShapeDtypeStruct((num_tiles, n, e), jnp.float32),
        ),
        compiler_params=pltpu.CompilerParams(
            dimension_semantics=("parallel",),
            vmem_limit_bytes=vmem_limit,
        ),
    )(a_img, b_img, w_feat_k, w_lp_k, w_emb_k)

    # Tiny epilogue: O(num_tiles + N*E) cross-tile reduction + cosine similarity.
    l2 = jnp.sum(sums[:, 0, 0]) / (n * c * h * w)
    lpips = jnp.sum(sums[:, 0, 1]) / (n * h * w)
    ea = jnp.sum(ea_p, axis=0)                    # (N, E)
    eb = jnp.sum(eb_p, axis=0)
    dot = jnp.sum(ea * eb, axis=-1)
    # TODO(synk): uses rsqrt(||e||^2 + eps) instead of F.cosine_similarity's
    # clamp(norm, min=eps); equivalent away from the zero-norm corner case.
    cos = (dot * jax.lax.rsqrt(jnp.sum(ea * ea, axis=-1) + EPS_COS)
               * jax.lax.rsqrt(jnp.sum(eb * eb, axis=-1) + EPS_COS))
    face = jnp.mean(1.0 - cos)
    return face_weight * face + l2_weight * l2 + lpips_weight * lpips


def _reference_loss(a, b, w_feat, w_lp, w_emb,
                    l2_weight=L2_WEIGHT, lpips_weight=LPIPS_WEIGHT,
                    face_weight=FACE_WEIGHT):
    """Pure-JAX f32 reference used only for the self-check in __main__."""
    n = a.shape[0]
    l2 = jnp.mean((a - b) ** 2)

    def norm_feats(x):
        feats = jnp.einsum('nchw,cf->nfhw', x, w_feat)
        nrm = jnp.sqrt(jnp.sum(feats * feats, axis=1, keepdims=True))
        return feats / (nrm + EPS_NORM)

    fd = norm_feats(a) - norm_feats(b)
    lpips = jnp.mean(jnp.sum(fd * fd * w_lp[None, :, None, None], axis=1))

    w_e = w_emb.astype(jnp.float32)
    ea = a.reshape(n, -1) @ w_e
    eb = b.reshape(n, -1) @ w_e
    cos = (jnp.sum(ea * eb, -1)
           * jax.lax.rsqrt(jnp.sum(ea * ea, -1) + EPS_COS)
           * jax.lax.rsqrt(jnp.sum(eb * eb, -1) + EPS_COS))
    face = jnp.mean(1.0 - cos)
    return face_weight * face + l2_weight * l2 + lpips_weight * lpips


if __name__ == "__main__":
    key = jax.random.PRNGKey(0)
    k_a, k_b, k_f, k_lp, k_e = jax.random.split(key, 5)

    # Small shapes consistent with the forward: NCHW RGB images, imsize=16.
    N, C, H, W = 2, 3, 16, 16
    F, E = 128, 128                      # LPIPS feature dim, face-embedding dim

    a = jax.random.normal(k_a, (N, C, H, W), jnp.float32)
    b = jax.random.normal(k_b, (N, C, H, W), jnp.float32)

    # Deterministic synthetic stand-ins for the pretrained backbones.
    w_feat = jax.random.normal(k_f, (C, F), jnp.float32) * 0.1
    w_lp = jax.random.uniform(k_lp, (F,), jnp.float32)      # LPIPS lin weights (>= 0)
    # Face-embedding weights stored in bf16 once (host-side cast; the kernel streams bf16).
    w_emb = (jax.random.normal(k_e, (C * H * W, E), jnp.float32) * 0.02
             ).astype(jnp.bfloat16)

    loss_fn = jax.jit(face_imsim_loss)
    loss = jax.block_until_ready(loss_fn(a, b, w_feat, w_lp, w_emb))

    ref = _reference_loss(a, b, w_feat, w_lp, w_emb)
    # Looser tolerance when the bf16 LPIPS feature path is active (v6e/v7x).
    tol = 3e-2 if _tpu_generation() >= 6 else 1e-2
    assert loss.shape == () and bool(jnp.isfinite(loss))
    assert jnp.allclose(loss, ref, rtol=tol, atol=tol), (loss, ref)
    print("KERNEL_OK")
</pallas_src>

<mosaic_0001>
module attributes {stable_mosaic.version = 11 : i64} {
  func.func @_imsim_tile_kernel(%arg0: i32, %arg1: memref<2x3x128xf32, #tpu.memory_space<vmem>>, %arg2: memref<2x3x128xf32, #tpu.memory_space<vmem>>, %arg3: memref<3x128x1xf32, #tpu.memory_space<vmem>>, %arg4: memref<128x1xf32, #tpu.memory_space<vmem>>, %arg5: memref<3x128x128xbf16, #tpu.memory_space<vmem>>, %arg6: memref<1x1x128xf32, #tpu.memory_space<vmem>>, %arg7: memref<1x2x128xf32, #tpu.memory_space<vmem>>, %arg8: memref<1x2x128xf32, #tpu.memory_space<vmem>>) attributes {dimension_semantics = [#tpu.dimension_semantics<parallel>], iteration_bounds = array<i64: 2>, scalar_prefetch = 0 : i64, scratch_operands = 0 : i64, tpu.core_type = #tpu.core_type<tc>, window_params = [{transform_indices = @transform_0, window_bounds = array<i64: 2, 3, 128>}, {transform_indices = @transform_1, window_bounds = array<i64: 2, 3, 128>}, {pipeline_mode = #tpu.pipeline_mode<synchronous>, transform_indices = @transform_2, window_bounds = array<i64: 3, 128, 1>}, {pipeline_mode = #tpu.pipeline_mode<synchronous>, transform_indices = @transform_3, window_bounds = array<i64: 128, 1>}, {transform_indices = @transform_4, window_bounds = array<i64: 3, 128, 128>}, {transform_indices = @transform_5, window_bounds = array<i64: 1, 1, 128>}, {transform_indices = @transform_6, window_bounds = array<i64: 1, 2, 128>}, {transform_indices = @transform_7, window_bounds = array<i64: 1, 2, 128>}]} {
    %c0 = arith.constant 0 : index
    %c0_0 = arith.constant 0 : index
    %c0_1 = arith.constant 0 : index
    %0 = vector.load %arg1[%c0, %c0_0, %c0_1] : memref<2x3x128xf32, #tpu.memory_space<vmem>>, vector<2x3x128xf32>
    %c0_2 = arith.constant 0 : index
    %c0_3 = arith.constant 0 : index
    %c0_4 = arith.constant 0 : index
    %1 = vector.load %arg2[%c0_2, %c0_3, %c0_4] : memref<2x3x128xf32, #tpu.memory_space<vmem>>, vector<2x3x128xf32>
    %2 = arith.subf %0, %1 : vector<2x3x128xf32>
    %3 = arith.mulf %2, %2 : vector<2x3x128xf32>
    %4 = vector.shape_cast %3 : vector<2x3x128xf32> to vector<1x2x3x128xf32>
    %cst = arith.constant dense<0.000000e+00> : vector<1xf32>
    %5 = vector.multi_reduction <add>, %4, %cst [1, 2, 3] : vector<1x2x3x128xf32> to vector<1xf32>
    %6 = vector.shape_cast %5 : vector<1xf32> to vector<1x1x1x1xf32>
    %7 = vector.extract %6[0, 0, 0, 0] : f32 from vector<1x1x1x1xf32>
    %8 = arith.truncf %0 : vector<2x3x128xf32> to vector<2x3x128xbf16>
    %9 = arith.truncf %1 : vector<2x3x128xf32> to vector<2x3x128xbf16>
    %c0_5 = arith.constant 0 : index
    %c0_6 = arith.constant 0 : index
    %c0_7 = arith.constant 0 : index
    %10 = vector.load %arg3[%c0_5, %c0_6, %c0_7] : memref<3x128x1xf32, #tpu.memory_space<vmem>>, vector<3x128x1xf32>
    %11 = arith.truncf %10 : vector<3x128x1xf32> to vector<3x128x1xbf16>
    %12 = vector.extract_strided_slice %8 {offsets = [0, 0, 0], sizes = [2, 1, 128], strides = [1, 1, 1]} : vector<2x3x128xbf16> to vector<2x1x128xbf16>
    %13 = vector.extract_strided_slice %11 {offsets = [0, 0, 0], sizes = [1, 128, 1], strides = [1, 1, 1]} : vector<3x128x1xbf16> to vector<1x128x1xbf16>
    %14 = vector.shape_cast %13 : vector<1x128x1xbf16> to vector<128x1xbf16>
    %15 = vector.shape_cast %14 : vector<128x1xbf16> to vector<1x128x1xbf16>
    %16 = vector.broadcast %12 : vector<2x1x128xbf16> to vector<2x128x128xbf16>
    %17 = vector.broadcast %15 : vector<1x128x1xbf16> to vector<2x128x128xbf16>
    %18 = arith.mulf %16, %17 : vector<2x128x128xbf16>
    %19 = vector.extract_strided_slice %9 {offsets = [0, 0, 0], sizes = [2, 1, 128], strides = [1, 1, 1]} : vector<2x3x128xbf16> to vector<2x1x128xbf16>
    %20 = vector.extract_strided_slice %11 {offsets = [0, 0, 0], sizes = [1, 128, 1], strides = [1, 1, 1]} : vector<3x128x1xbf16> to vector<1x128x1xbf16>
    %21 = vector.shape_cast %20 : vector<1x128x1xbf16> to vector<128x1xbf16>
    %22 = vector.shape_cast %21 : vector<128x1xbf16> to vector<1x128x1xbf16>
    %23 = vector.broadcast %19 : vector<2x1x128xbf16> to vector<2x128x128xbf16>
    %24 = vector.broadcast %22 : vector<1x128x1xbf16> to vector<2x128x128xbf16>
    %25 = arith.mulf %23, %24 : vector<2x128x128xbf16>
    %26 = vector.extract_strided_slice %8 {offsets = [0, 1, 0], sizes = [2, 1, 128], strides = [1, 1, 1]} : vector<2x3x128xbf16> to vector<2x1x128xbf16>
    %27 = vector.extract_strided_slice %11 {offsets = [1, 0, 0], sizes = [1, 128, 1], strides = [1, 1, 1]} : vector<3x128x1xbf16> to vector<1x128x1xbf16>
    %28 = vector.shape_cast %27 : vector<1x128x1xbf16> to vector<128x1xbf16>
    %29 = vector.shape_cast %28 : vector<128x1xbf16> to vector<1x128x1xbf16>
    %30 = vector.broadcast %26 : vector<2x1x128xbf16> to vector<2x128x128xbf16>
    %31 = vector.broadcast %29 : vector<1x128x1xbf16> to vector<2x128x128xbf16>
    %32 = arith.mulf %30, %31 : vector<2x128x128xbf16>
    %33 = arith.addf %18, %32 : vector<2x128x128xbf16>
    %34 = vector.extract_strided_slice %9 {offsets = [0, 1, 0], sizes = [2, 1, 128], strides = [1, 1, 1]} : vector<2x3x128xbf16> to vector<2x1x128xbf16>
    %35 = vector.extract_strided_slice %11 {offsets = [1, 0, 0], sizes = [1, 128, 1], strides = [1, 1, 1]} : vector<3x128x1xbf16> to vector<1x128x1xbf16>
    %36 = vector.shape_cast %35 : vector<1x128x1xbf16> to vector<128x1xbf16>
    %37 = vector.shape_cast %36 : vector<128x1xbf16> to vector<1x128x1xbf16>
    %38 = vector.broadcast %34 : vector<2x1x128xbf16> to vector<2x128x128xbf16>
    %39 = vector.broadcast %37 : vector<1x128x1xbf16> to vector<2x128x128xbf16>
    %40 = arith.mulf %38, %39 : vector<2x128x128xbf16>
    %41 = arith.addf %25, %40 : vector<2x128x128xbf16>
    %42 = vector.extract_strided_slice %8 {offsets = [0, 2, 0], sizes = [2, 1, 128], strides = [1, 1, 1]} : vector<2x3x128xbf16> to vector<2x1x128xbf16>
    %43 = vector.extract_strided_slice %11 {offsets = [2, 0, 0], sizes = [1, 128, 1], strides = [1, 1, 1]} : vector<3x128x1xbf16> to vector<1x128x1xbf16>
    %44 = vector.shape_cast %43 : vector<1x128x1xbf16> to vector<128x1xbf16>
    %45 = vector.shape_cast %44 : vector<128x1xbf16> to vector<1x128x1xbf16>
    %46 = vector.broadcast %42 : vector<2x1x128xbf16> to vector<2x128x128xbf16>
    %47 = vector.broadcast %45 : vector<1x128x1xbf16> to vector<2x128x128xbf16>
    %48 = arith.mulf %46, %47 : vector<2x128x128xbf16>
    %49 = arith.addf %33, %48 : vector<2x128x128xbf16>
    %50 = vector.extract_strided_slice %9 {offsets = [0, 2, 0], sizes = [2, 1, 128], strides = [1, 1, 1]} : vector<2x3x128xbf16> to vector<2x1x128xbf16>
    %51 = vector.extract_strided_slice %11 {offsets = [2, 0, 0], sizes = [1, 128, 1], strides = [1, 1, 1]} : vector<3x128x1xbf16> to vector<1x128x1xbf16>
    %52 = vector.shape_cast %51 : vector<1x128x1xbf16> to vector<128x1xbf16>
    %53 = vector.shape_cast %52 : vector<128x1xbf16> to vector<1x128x1xbf16>
    %54 = vector.broadcast %50 : vector<2x1x128xbf16> to vector<2x128x128xbf16>
    %55 = vector.broadcast %53 : vector<1x128x1xbf16> to vector<2x128x128xbf16>
    %56 = arith.mulf %54, %55 : vector<2x128x128xbf16>
    %57 = arith.addf %41, %56 : vector<2x128x128xbf16>
    %58 = arith.mulf %49, %49 : vector<2x128x128xbf16>
    %59 = arith.extf %58 : vector<2x128x128xbf16> to vector<2x128x128xf32>
    %cst_8 = arith.constant dense<0.000000e+00> : vector<2x128xf32>
    %60 = vector.multi_reduction <add>, %59, %cst_8 [1] : vector<2x128x128xf32> to vector<2x128xf32>
    %61 = vector.shape_cast %60 : vector<2x128xf32> to vector<2x1x128xf32>
    %62 = arith.mulf %57, %57 : vector<2x128x128xbf16>
    %63 = arith.extf %62 : vector<2x128x128xbf16> to vector<2x128x128xf32>
    %cst_9 = arith.constant dense<0.000000e+00> : vector<2x128xf32>
    %64 = vector.multi_reduction <add>, %63, %cst_9 [1] : vector<2x128x128xf32> to vector<2x128xf32>
    %65 = vector.shape_cast %64 : vector<2x128xf32> to vector<2x1x128xf32>
    %66 = math.sqrt %61 : vector<2x1x128xf32>
    %cst_10 = arith.constant 1.000000e-10 : f32
    %67 = vector.broadcast %cst_10 : f32 to vector<2x1x128xf32>
    %68 = arith.addf %66, %67 : vector<2x1x128xf32>
    %69 = tpu.reciprocal %68 {approx = true} : vector<2x1x128xf32> -> vector<2x1x128xf32>
    %70 = arith.truncf %69 : vector<2x1x128xf32> to vector<2x1x128xbf16>
    %71 = math.sqrt %65 : vector<2x1x128xf32>
    %cst_11 = arith.constant 1.000000e-10 : f32
    %72 = vector.broadcast %cst_11 : f32 to vector<2x1x128xf32>
    %73 = arith.addf %71, %72 : vector<2x1x128xf32>
    %74 = tpu.reciprocal %73 {approx = true} : vector<2x1x128xf32> -> vector<2x1x128xf32>
    %75 = arith.truncf %74 : vector<2x1x128xf32> to vector<2x1x128xbf16>
    %76 = vector.broadcast %70 : vector<2x1x128xbf16> to vector<2x128x128xbf16>
    %77 = arith.mulf %49, %76 : vector<2x128x128xbf16>
    %78 = vector.broadcast %75 : vector<2x1x128xbf16> to vector<2x128x128xbf16>
    %79 = arith.mulf %57, %78 : vector<2x128x128xbf16>
    %80 = arith.subf %77, %79 : vector<2x128x128xbf16>
    %81 = arith.mulf %80, %80 : vector<2x128x128xbf16>
    %c0_12 = arith.constant 0 : index
    %c0_13 = arith.constant 0 : index
    %82 = vector.load %arg4[%c0_12, %c0_13] : memref<128x1xf32, #tpu.memory_space<vmem>>, vector<128x1xf32>
    %83 = vector.shape_cast %82 : vector<128x1xf32> to vector<1x128x1xf32>
    %84 = arith.truncf %83 : vector<1x128x1xf32> to vector<1x128x1xbf16>
    %85 = vector.broadcast %84 : vector<1x128x1xbf16> to vector<2x128x128xbf16>
    %86 = arith.mulf %81, %85 : vector<2x128x128xbf16>
    %87 = arith.extf %86 : vector<2x128x128xbf16> to vector<2x128x128xf32>
    %88 = vector.shape_cast %87 : vector<2x128x128xf32> to vector<1x2x128x128xf32>
    %cst_14 = arith.constant dense<0.000000e+00> : vector<1xf32>
    %89 = vector.multi_reduction <add>, %88, %cst_14 [1, 2, 3] : vector<1x2x128x128xf32> to vector<1xf32>
    %90 = vector.shape_cast %89 : vector<1xf32> to vector<1x1x1x1xf32>
    %91 = vector.extract %90[0, 0, 0, 0] : f32 from vector<1x1x1x1xf32>
    %92 = tpu.concatenate %8, %9 in 0 : vector<2x3x128xbf16>, vector<2x3x128xbf16> -> vector<4x3x128xbf16>
    %cst_15 = arith.constant 0.000000e+00 : f32
    %93 = vector.broadcast %cst_15 : f32 to vector<4x128xf32>
    %94 = vector.extract_strided_slice %92 {offsets = [0, 0, 0], sizes = [4, 1, 128], strides = [1, 1, 1]} : vector<4x3x128xbf16> to vector<4x1x128xbf16>
    %95 = vector.shape_cast %94 : vector<4x1x128xbf16> to vector<4x128xbf16>
    %c0_16 = arith.constant 0 : index
    %c0_17 = arith.constant 0 : index
    %c0_18 = arith.constant 0 : index
    %96 = vector.load %arg5[%c0_16, %c0_17, %c0_18] : memref<3x128x128xbf16, #tpu.memory_space<vmem>>, vector<1x128x128xbf16>
    %97 = vector.shape_cast %96 : vector<1x128x128xbf16> to vector<128x128xbf16>
    %cst_19 = arith.constant dense<0.000000e+00> : vector<4x128xf32>
    %98 = tpu.matmul %95, %97, %cst_19 {dimension_numbers = #tpu.dot_dimension_numbers<[1], [0], [0], [1], [0, 0, 1, 1], [], []>} : vector<4x128xbf16>, vector<128x128xbf16>, vector<4x128xf32> -> vector<4x128xf32>
    %99 = arith.addf %93, %98 : vector<4x128xf32>
    %100 = vector.extract_strided_slice %92 {offsets = [0, 1, 0], sizes = [4, 1, 128], strides = [1, 1, 1]} : vector<4x3x128xbf16> to vector<4x1x128xbf16>
    %101 = vector.shape_cast %100 : vector<4x1x128xbf16> to vector<4x128xbf16>
    %c1 = arith.constant 1 : index
    %c0_20 = arith.constant 0 : index
    %c0_21 = arith.constant 0 : index
    %102 = vector.load %arg5[%c1, %c0_20, %c0_21] : memref<3x128x128xbf16, #tpu.memory_space<vmem>>, vector<1x128x128xbf16>
    %103 = vector.shape_cast %102 : vector<1x128x128xbf16> to vector<128x128xbf16>
    %cst_22 = arith.constant dense<0.000000e+00> : vector<4x128xf32>
    %104 = tpu.matmul %101, %103, %cst_22 {dimension_numbers = #tpu.dot_dimension_numbers<[1], [0], [0], [1], [0, 0, 1, 1], [], []>} : vector<4x128xbf16>, vector<128x128xbf16>, vector<4x128xf32> -> vector<4x128xf32>
    %105 = arith.addf %99, %104 : vector<4x128xf32>
    %106 = vector.extract_strided_slice %92 {offsets = [0, 2, 0], sizes = [4, 1, 128], strides = [1, 1, 1]} : vector<4x3x128xbf16> to vector<4x1x128xbf16>
    %107 = vector.shape_cast %106 : vector<4x1x128xbf16> to vector<4x128xbf16>
    %c2 = arith.constant 2 : index
    %c0_23 = arith.constant 0 : index
    %c0_24 = arith.constant 0 : index
    %108 = vector.load %arg5[%c2, %c0_23, %c0_24] : memref<3x128x128xbf16, #tpu.memory_space<vmem>>, vector<1x128x128xbf16>
    %109 = vector.shape_cast %108 : vector<1x128x128xbf16> to vector<128x128xbf16>
    %cst_25 = arith.constant dense<0.000000e+00> : vector<4x128xf32>
    %110 = tpu.matmul %107, %109, %cst_25 {dimension_numbers = #tpu.dot_dimension_numbers<[1], [0], [0], [1], [0, 0, 1, 1], [], []>} : vector<4x128xbf16>, vector<128x128xbf16>, vector<4x128xf32> -> vector<4x128xf32>
    %111 = arith.addf %105, %110 : vector<4x128xf32>
    %112 = vector.extract_strided_slice %111 {offsets = [0, 0], sizes = [2, 128], strides = [1, 1]} : vector<4x128xf32> to vector<2x128xf32>
    %c0_26 = arith.constant 0 : index
    %c0_27 = arith.constant 0 : index
    %c0_28 = arith.constant 0 : index
    %113 = vector.load %arg7[%c0_26, %c0_27, %c0_28] : memref<1x2x128xf32, #tpu.memory_space<vmem>>, vector<1x2x128xf32>
    %114 = vector.shape_cast %113 : vector<1x2x128xf32> to vector<2x128xf32>
    %115 = vector.shape_cast %112 : vector<2x128xf32> to vector<1x2x128xf32>
    tpu.vector_store %arg7[%c0_26, %c0_27, %c0_28], %115 {strides = array<i32>} : memref<1x2x128xf32, #tpu.memory_space<vmem>>, vector<1x2x128xf32>,
    %116 = vector.extract_strided_slice %111 {offsets = [2, 0], sizes = [2, 128], strides = [1, 1]} : vector<4x128xf32> to vector<2x128xf32>
    %c0_29 = arith.constant 0 : index
    %c0_30 = arith.constant 0 : index
    %c0_31 = arith.constant 0 : index
    %117 = vector.load %arg8[%c0_29, %c0_30, %c0_31] : memref<1x2x128xf32, #tpu.memory_space<vmem>>, vector<1x2x128xf32>
    %118 = vector.shape_cast %117 : vector<1x2x128xf32> to vector<2x128xf32>
    %119 = vector.shape_cast %116 : vector<2x128xf32> to vector<1x2x128xf32>
    tpu.vector_store %arg8[%c0_29, %c0_30, %c0_31], %119 {strides = array<i32>} : memref<1x2x128xf32, #tpu.memory_space<vmem>>, vector<1x2x128xf32>,
    %120 = tpu.iota {dimensions = array<i32: 2>} : vector<1x1x128xi32>
    %c0_i32 = arith.constant 0 : i32
    %121 = vector.broadcast %c0_i32 : i32 to vector<1x1x128xi32>
    %122 = arith.cmpi eq, %120, %121 : vector<1x1x128xi32>
    %c1_i32 = arith.constant 1 : i32
    %123 = vector.broadcast %c1_i32 : i32 to vector<1x1x128xi32>
    %124 = arith.cmpi eq, %120, %123 : vector<1x1x128xi32>
    %cst_32 = arith.constant 0.000000e+00 : f32
    %125 = vector.broadcast %91 : f32 to vector<1x1x128xf32>
    %126 = vector.broadcast %cst_32 : f32 to vector<1x1x128xf32>
    %127 = arith.select %124, %125, %126 : vector<1x1x128xi1>, vector<1x1x128xf32>
    %128 = vector.broadcast %7 : f32 to vector<1x1x128xf32>
    %129 = arith.select %122, %128, %127 : vector<1x1x128xi1>, vector<1x1x128xf32>
    %c0_33 = arith.constant 0 : index
    %c0_34 = arith.constant 0 : index
    %c0_35 = arith.constant 0 : index
    %130 = vector.load %arg6[%c0_33, %c0_34, %c0_35] : memref<1x1x128xf32, #tpu.memory_space<vmem>>, vector<1x1x128xf32>
    tpu.vector_store %arg6[%c0_33, %c0_34, %c0_35], %129 {strides = array<i32>} : memref<1x1x128xf32, #tpu.memory_space<vmem>>, vector<1x1x128xf32>,
    return
  }
  func.func @transform_0(%arg0: i32) -> (i32, i32, i32) {
    %c0_i32 = arith.constant 0 : i32
    %c0_i32_0 = arith.constant 0 : i32
    %c0_i32_1 = arith.constant 0 : i32
    return %c0_i32, %c0_i32_0, %arg0 : i32, i32, i32
  }
  func.func @transform_1(%arg0: i32) -> (i32, i32, i32) {
    %c0_i32 = arith.constant 0 : i32
    %c0_i32_0 = arith.constant 0 : i32
    %c0_i32_1 = arith.constant 0 : i32
    return %c0_i32, %c0_i32_0, %arg0 : i32, i32, i32
  }
  func.func @transform_2(%arg0: i32) -> (i32, i32, i32) {
    %c0_i32 = arith.constant 0 : i32
    %c0_i32_0 = arith.constant 0 : i32
    %c0_i32_1 = arith.constant 0 : i32
    %c0_i32_2 = arith.constant 0 : i32
    return %c0_i32, %c0_i32_0, %c0_i32_1 : i32, i32, i32
  }
  func.func @transform_3(%arg0: i32) -> (i32, i32) {
    %c0_i32 = arith.constant 0 : i32
    %c0_i32_0 = arith.constant 0 : i32
    %c0_i32_1 = arith.constant 0 : i32
    return %c0_i32, %c0_i32_0 : i32, i32
  }
  func.func @transform_4(%arg0: i32) -> (i32, i32, i32) {
    %c0_i32 = arith.constant 0 : i32
    %c0_i32_0 = arith.constant 0 : i32
    %c0_i32_1 = arith.constant 0 : i32
    return %c0_i32, %arg0, %c0_i32_0 : i32, i32, i32
  }
  func.func @transform_5(%arg0: i32) -> (i32, i32, i32) {
    %c0_i32 = arith.constant 0 : i32
    %c0_i32_0 = arith.constant 0 : i32
    %c0_i32_1 = arith.constant 0 : i32
    return %arg0, %c0_i32, %c0_i32_0 : i32, i32, i32
  }
  func.func @transform_6(%arg0: i32) -> (i32, i32, i32) {
    %c0_i32 = arith.constant 0 : i32
    %c0_i32_0 = arith.constant 0 : i32
    %c0_i32_1 = arith.constant 0 : i32
    return %arg0, %c0_i32, %c0_i32_0 : i32, i32, i32
  }
  func.func @transform_7(%arg0: i32) -> (i32, i32, i32) {
    %c0_i32 = arith.constant 0 : i32
    %c0_i32_0 = arith.constant 0 : i32
    %c0_i32_1 = arith.constant 0 : i32
    return %arg0, %c0_i32, %c0_i32_0 : i32, i32, i32
  }
}

</mosaic_0001>

<bundles_post_ra>
// kernel: face_imsim_loss.1
= control target key start
LH: loop header
LB: loop body
LE: loop exit
PB: predicated region body
PF: predicated region fallthrough
CT: control target
= control target key end

     0   :  { %s2363_s24 = smov 0   ;;  %s2365_s25 = smov 0   ;;  %s3208_s0 = inlined_call_operand.vmem [shape: f32[2,3,256], index: 0, kind: input, shape index: {}]   ;;  %s3209_s1 = inlined_call_operand.vmem [shape: f32[2,3,256], index: 1, kind: input, shape index: {}]   ;;  %s3210_s2 = inlined_call_operand.vmem [shape: f32[3,128,1], index: 2, kind: input, shape index: {}]   ;;  %s3211_s3 = inlined_call_operand.vmem [shape: f32[128,1], index: 3, kind: input, shape index: {}]   ;;  %s3212_s4 = inlined_call_operand.vmem [shape: bf16[3,256,128], index: 4, kind: input, shape index: {}]   ;;  %s3213_s5 = inlined_call_operand.vmem [shape: f32[2,1,128], index: 5, kind: output, shape index: {0}]   ;;  %s3214_s6 = inlined_call_operand.vmem [shape: f32[2,2,128], index: 6, kind: output, shape index: {1}]   ;;  %s3215_s7 = inlined_call_operand.vmem [shape: f32[2,2,128], index: 7, kind: output, shape index: {2}]  }
   0x1   :  { %s2367_s26 = smov 0  }
   0x2 LB: > { %s2055_s27 = sadd.s32 4294967295, %s2318_s26   ;;  %s2380_s28 = sadd.s32 1, %s2318_s26   ;;  %s2318_s26 = sphi %s2367_s26, %s3275_s26   ;;  %s2314_s25 = sphi %s2365_s25, %s3274_s25   ;;  %s2310_s24 = sphi %s2363_s24, %s3273_s24  }
   0x3   : > { %s22_s29 = ssub.s32 %s2318_s26, %s2380_s28  ;;  %s25_s30 = sadd.s32 1, %s2314_s25 }
   0x4   : > { %p23_p0 = scmp.eq.s32.totalorder %s22_s29, 0  ;;  %p32_p1 = scmp.ne.s32.totalorder %s2314_s25, %s2310_s24 }
   0x5   : > { %p33_p2 = scmp.eq.s32.totalorder %s2318_s26, 0  ;;  %p2058_p4 = scmp.ge.s32.totalorder %s2318_s26, 2 }
   0x6   : > { %s2389_s8 = scalar_select %p23_p0, %s2314_s25, %s25_s30  }
   0x7   : > { %p2391_p3 = por %p33_p2, %p32_p1  ;;  %236 = sbr.rel (%p2058_p4) target bundleno = 45 (0x2d), region = 24 }
   0xe   : > { %239 = sbr.rel (!%p2391_p3) target bundleno = 21 (0x15), region = 28  ;;  %s241_s10 = sand.u32 (%p2391_p3), 1, %s2314_s25  }
   0xf   : > { %s2060_s11 = sshll.u32 (%p2391_p3), %s2318_s26, 2  ;;  %s2059_s12 = sshll.u32 (%p2391_p3), %s241_s10, 3 }
  0x10   : > { %s245_s15 = scalar_lea.vmem (%p2391_p3), %s3208_s0, %s2060_s11  ;;  %s243_s16 = scalar_lea.vmem (%p2391_p3), [#allocation2], %s2059_s12 }
  0x11   : > { %v261_v0 = vld [vmem:[%s245_s15] sm:$0xf] (%p2391_p3)  ;;  %v263_v1 = vld [vmem:[%s245_s15 + $0x8] sm:$0xf] (%p2391_p3) }
  0x12   : > { %262 = vst [vmem:[%s243_s16] sm:$0xf] (%p2391_p3), %v261_v0  ;;  %264 = vst [vmem:[%s243_s16 + $0x4] sm:$0xf] (%p2391_p3), %v263_v1 }
  0x15 PF: > { %291 = sbr.rel (!%p2391_p3) target bundleno = 28 (0x1c), region = 69  ;;  %s293_s17 = sand.u32 (%p2391_p3), 1, %s2314_s25  }
  0x16   : > { %s2062_s18 = sshll.u32 (%p2391_p3), %s2318_s26, 2  ;;  %s2061_s19 = sshll.u32 (%p2391_p3), %s293_s17, 3 }
  0x17   : > { %s297_s22 = scalar_lea.vmem (%p2391_p3), %s3209_s1, %s2062_s18  ;;  %s295_s23 = scalar_lea.vmem (%p2391_p3), [#allocation3], %s2061_s19 }
  0x18   : > { %v313_v2 = vld [vmem:[%s297_s22] sm:$0xf] (%p2391_p3)  ;;  %v315_v3 = vld [vmem:[%s297_s22 + $0x8] sm:$0xf] (%p2391_p3) }
  0x19   : > { %314 = vst [vmem:[%s295_s23] sm:$0xf] (%p2391_p3), %v313_v2  ;;  %316 = vst [vmem:[%s295_s23 + $0x4] sm:$0xf] (%p2391_p3), %v315_v3 }
  0x1c PF: > { %343 = sbr.rel (!%p2391_p3) target bundleno = 45 (0x2d), region = 110  ;;  %s345_s29 = sand.u32 (%p2391_p3), 1, %s2314_s25  }
  0x1d   : > { %s2128_s30 = sshll.u32 (%p2391_p3), %s2318_s26, 6  ;;  %s2221_s10 = smul.u32 (%p2391_p3), 192, %s345_s29 }
  0x1e   : > { %s2417_s13 = scalar_lea.vmem (%p2391_p3), %s3212_s4, %s2128_s30 }
  0x1f   : > { %v366_v4 = vld [vmem:[%s2417_s13] sm:$0xff] (%p2391_p3)   ;;  %v370_v5 = vld [vmem:[%s2417_s13 + $0x8] sm:$0xff] (%p2391_p3)   ;;  %v374_v6 = vld [vmem:[%s2417_s13 + $0x10] sm:$0xff] (%p2391_p3)   ;;  %s2425_s9 = scalar_lea.vmem (%p2391_p3), [#allocation4], %s2221_s10 }
  0x20   : > { %v378_v7 = vld [vmem:[%s2417_s13 + $0x18] sm:$0xff] (%p2391_p3)   ;;  %v382_v8 = vld [vmem:[%s2417_s13 + $0x20] sm:$0xff] (%p2391_p3)   ;;  %v386_v9 = vld [vmem:[%s2417_s13 + $0x28] sm:$0xff] (%p2391_p3)   ;;  %367 = vst [vmem:[%s2425_s9] sm:$0xff] (%p2391_p3), %v366_v4  }
  0x21   : > { %371 = vst [vmem:[%s2425_s9 + $0x8] sm:$0xff] (%p2391_p3), %v370_v5   ;;  %375 = vst [vmem:[%s2425_s9 + $0x10] sm:$0xff] (%p2391_p3), %v374_v6   ;;  %v390_v10 = vld [vmem:[%s2417_s13 + $0x30] sm:$0xff] (%p2391_p3)   ;;  %v394_v11 = vld [vmem:[%s2417_s13 + $0x38] sm:$0xff] (%p2391_p3)  }
  0x22   : > { %379 = vst [vmem:[%s2425_s9 + $0x18] sm:$0xff] (%p2391_p3), %v378_v7   ;;  %383 = vst [vmem:[%s2425_s9 + $0x20] sm:$0xff] (%p2391_p3), %v382_v8   ;;  %v398_v12 = vld [vmem:[%s2417_s13 + $0x80] sm:$0xff] (%p2391_p3)   ;;  %v402_v13 = vld [vmem:[%s2417_s13 + $0x88] sm:$0xff] (%p2391_p3)  }
  0x23   : > { %387 = vst [vmem:[%s2425_s9 + $0x28] sm:$0xff] %v386_v9   ;;  %391 = vst [vmem:[%s2425_s9 + $0x30] sm:$0xff] %v390_v10   ;;  %v406_v14 = vld [vmem:[%s2417_s13 + $0x90] sm:$0xff]   ;;  %v410_v15 = vld [vmem:[%s2417_s13 + $0x98] sm:$0xff]  }
  0x24   : > { %395 = vst [vmem:[%s2425_s9 + $0x38] sm:$0xff] %v394_v11   ;;  %399 = vst [vmem:[%s2425_s9 + $0x40] sm:$0xff] %v398_v12   ;;  %v414_v16 = vld [vmem:[%s2417_s13 + $0xa0] sm:$0xff]   ;;  %v418_v17 = vld [vmem:[%s2417_s13 + $0xa8] sm:$0xff]  }
  0x25   : > { %403 = vst [vmem:[%s2425_s9 + $0x48] sm:$0xff] %v402_v13   ;;  %407 = vst [vmem:[%s2425_s9 + $0x50] sm:$0xff] %v406_v14   ;;  %v422_v18 = vld [vmem:[%s2417_s13 + $0xb0] sm:$0xff]   ;;  %v426_v19 = vld [vmem:[%s2417_s13 + $0xb8] sm:$0xff]  }
  0x26   : > { %411 = vst [vmem:[%s2425_s9 + $0x58] sm:$0xff] %v410_v15   ;;  %415 = vst [vmem:[%s2425_s9 + $0x60] sm:$0xff] %v414_v16   ;;  %v430_v20 = vld [vmem:[%s2417_s13 + $0x100] sm:$0xff]   ;;  %v434_v21 = vld [vmem:[%s2417_s13 + $0x108] sm:$0xff]  }
  0x27   : > { %419 = vst [vmem:[%s2425_s9 + $0x68] sm:$0xff] %v418_v17   ;;  %423 = vst [vmem:[%s2425_s9 + $0x70] sm:$0xff] %v422_v18   ;;  %v438_v22 = vld [vmem:[%s2417_s13 + $0x110] sm:$0xff]   ;;  %v442_v23 = vld [vmem:[%s2417_s13 + $0x118] sm:$0xff]  }
  0x28   : > { %427 = vst [vmem:[%s2425_s9 + $0x78] sm:$0xff] %v426_v19   ;;  %431 = vst [vmem:[%s2425_s9 + $0x80] sm:$0xff] %v430_v20   ;;  %v446_v24 = vld [vmem:[%s2417_s13 + $0x120] sm:$0xff]   ;;  %v450_v25 = vld [vmem:[%s2417_s13 + $0x128] sm:$0xff]  }
  0x29   : > { %435 = vst [vmem:[%s2425_s9 + $0x88] sm:$0xff] %v434_v21   ;;  %439 = vst [vmem:[%s2425_s9 + $0x90] sm:$0xff] %v438_v22   ;;  %v454_v26 = vld [vmem:[%s2417_s13 + $0x130] sm:$0xff]   ;;  %v458_v27 = vld [vmem:[%s2417_s13 + $0x138] sm:$0xff]  }
  0x2a   : > { %443 = vst [vmem:[%s2425_s9 + $0x98] sm:$0xff] %v442_v23   ;;  %447 = vst [vmem:[%s2425_s9 + $0xa0] sm:$0xff] %v446_v24  }
  0x2b   : > { %451 = vst [vmem:[%s2425_s9 + $0xa8] sm:$0xff] %v450_v25   ;;  %455 = vst [vmem:[%s2425_s9 + $0xb0] sm:$0xff] %v454_v26  }
  0x2c   : > { %459 = vst [vmem:[%s2425_s9 + $0xb8] sm:$0xff] %v458_v27  }
  0x2d PF: > { %p2065_p5 = scmp.ge.s32.totalorder %s2318_s26, 1  ;;  %p579_p6 = scmp.lt.s32.totalorder %s2318_s26, 3 }
  0x2f   : > { %p580_p7 = pnand %p2065_p5, %p579_p6 }
  0x31   : > { %583 = sbr.rel (%p580_p7) target bundleno = 596 (0x254), region = 151 }
  0x38   : > { %v685_v28 = vld [vmem:[%s3210_s2 + $0x10] sm:$0xff]  ;;  %v686_v29 = vld [vmem:[%s3210_s2 + $0x18] sm:$0xff]  ;;  %v683_v30 = vld [vmem:[%s3210_s2] sm:$0xff]  ;;  %v2320_v31 = vmov 0   ;;  %s586_s23 = sand.u32 1, %s2310_s24   ;;  %vm2322_vm0 = vmmov 0  }
  0x39   : > { %2255 = vset.pattern.permute.xlu1 %v2320_v31  ;;  %2254 = vset.pattern.permute.xlu0 %v2320_v31  ;;  %v732_v32 = vpack.c.bf16 %v686_v29, %v685_v28  ;;  %v684_v33 = vld [vmem:[%s3210_s2 + $0x8] sm:$0xff]  ;;  %v701_v34 = vld [vmem:[%s3210_s2 + $0x90] sm:$0xff]  ;;  %v702_v35 = vld [vmem:[%s3210_s2 + $0x98] sm:$0xff]  ;;  %s2222_s29 = smul.u32 192, %s586_s23  ;;  %s2066_s30 = sshll.u32 %s586_s23, 3  ;;  %vm1585_vm1 = vcmask 1041409  }
  0x3a   : > { %v731_v36 = vpack.c.bf16 %v684_v33, %v683_v30  ;;  %v699_v37 = vld [vmem:[%s3210_s2 + $0x80] sm:$0xff]  ;;  %v700_v38 = vld [vmem:[%s3210_s2 + $0x88] sm:$0xff]  ;;  %v740_v39 = vpack.c.bf16 %v702_v35, %v701_v34  ;;  %v717_v41 = vld [vmem:[%s3210_s2 + $0x110] sm:$0xff]  ;;  %s588_s11 = scalar_lea.vmem [#allocation2], %s2066_s30  ;;  %s595_s12 = scalar_lea.vmem [#allocation3], %s2066_s30  ;;  %vm1588_vm2 = vcmask 1042434  }
  0x3b   : > { %776 = vperm.xlu1 %2255, %v732_v32   ;;  %v739_v40 = vpack.c.bf16 %v700_v38, %v699_v37  ;;  %v718_v42 = vld [vmem:[%s3210_s2 + $0x118] sm:$0xff]  ;;  %v715_v43 = vld [vmem:[%s3210_s2 + $0x100] sm:$0xff]  ;;  %v716_v44 = vld [vmem:[%s3210_s2 + $0x108] sm:$0xff]  ;;  %s2664_s10 = scalar_lea.vmem [#allocation4], %s2222_s29  ;;  %vm1591_vm3 = vcmask 1043459   ;;  %vm666_vm4 = vcmask 1042432  }
  0x3c   : > { %771 = vperm.xlu0 %2254, %v731_v36   ;;  %v748_v45 = vpack.c.bf16 %v718_v42, %v717_v41  ;;  %v747_v46 = vpack.c.bf16 %v716_v44, %v715_v43  ;;  %v703_v47 = vld [vmem:[%s3210_s2 + $0xa0] sm:$0xff]  ;;  %v704_v48 = vld [vmem:[%s3210_s2 + $0xa8] sm:$0xff]  ;;  %v689_v53 = vld [vmem:[%s3210_s2 + $0x30] sm:$0xff]  ;;  %p646_p8 = scmp.lt.s32.totalorder %s2055_s27, 1 }
  0x3d   : > { %v687_v49 = vld [vmem:[%s3210_s2 + $0x20] sm:$0xff]  ;;  %v688_v50 = vld [vmem:[%s3210_s2 + $0x28] sm:$0xff]  ;;  %v741_v51 = vpack.c.bf16 %v704_v48, %v703_v47  ;;  %v690_v54 = vld [vmem:[%s3210_s2 + $0x38] sm:$0xff] }
  0x3e   : > { %v733_v52 = vpack.c.bf16 %v688_v50, %v687_v49  ;;  %v719_v55 = vld [vmem:[%s3210_s2 + $0x120] sm:$0xff]  ;;  %v720_v56 = vld [vmem:[%s3210_s2 + $0x128] sm:$0xff]  ;;  %v734_v57 = vpack.c.bf16 %v690_v54, %v689_v53  ;;  %v721_v59 = vld [vmem:[%s3210_s2 + $0x130] sm:$0xff]  ;;  %s3277_s27 = smov (!%p646_p8, %s2055_s27), 1 }
  0x3f   : > { %876 = vperm.xlu1 %2255, %v740_v39   ;;  %v749_v58 = vpack.c.bf16 %v720_v56, %v719_v55  ;;  %v722_v60 = vld [vmem:[%s3210_s2 + $0x138] sm:$0xff]  ;;  %v705_v61 = vld [vmem:[%s3210_s2 + $0xb0] sm:$0xff]  ;;  %v707_v1 = vld [vmem:[%s3210_s2 + $0xc0] sm:$0xff]  ;;  %s2068_s24 = sshll.u32 %s3277_s27, 1  ;;  %s648_s21 = scalar_lea.vmem %s3213_s5, %s3277_s27 }
  0x40   : > { %871 = vperm.xlu0 %2254, %v739_v40   ;;  %v706_v62 = vld [vmem:[%s3210_s2 + $0xb8] sm:$0xff]  ;;  %v750_v63 = vpack.c.bf16 %v722_v60, %v721_v59  ;;  %v708_v2 = vld [vmem:[%s3210_s2 + $0xc8] sm:$0xff]  ;;  %v691_v3 = vld [vmem:[%s3210_s2 + $0x40] sm:$0xff]  ;;  %s652_s14 = scalar_lea.vmem %s3214_s6, %s2068_s24  ;;  %s656_s17 = scalar_lea.vmem %s3215_s7, %s2068_s24 }
  0x41   : > { %v742_v0 = vpack.c.bf16 %v706_v62, %v705_v61  ;;  %v692_v4 = vld [vmem:[%s3210_s2 + $0x48] sm:$0xff]  ;;  %v743_v5 = vpack.c.bf16 %v708_v2, %v707_v1  ;;  %v693_v7 = vld [vmem:[%s3210_s2 + $0x50] sm:$0xff]  ;;  %v694_v8 = vld [vmem:[%s3210_s2 + $0x58] sm:$0xff]  ;;  %v3216_v61 = vlaneseq }
  0x42   : > { %v735_v6 = vpack.c.bf16 %v692_v4, %v691_v3  ;;  %v723_v9 = vld [vmem:[%s3210_s2 + $0x140] sm:$0xff]  ;;  %v724_v10 = vld [vmem:[%s3210_s2 + $0x148] sm:$0xff]  ;;  %v736_v11 = vpack.c.bf16 %v694_v8, %v693_v7  ;;  %v725_v13 = vld [vmem:[%s3210_s2 + $0x150] sm:$0xff]  ;;  %v3217_v8 = vmov 0.0  }
  0x43   : > { %1002 = vperm.xlu1 %2255, %v748_v45   ;;  %v751_v12 = vpack.c.bf16 %v724_v10, %v723_v9  ;;  %v726_v14 = vld [vmem:[%s3210_s2 + $0x158] sm:$0xff]  ;;  %v709_v15 = vld [vmem:[%s3210_s2 + $0xd0] sm:$0xff]  ;;  %v711_v19 = vld [vmem:[%s3210_s2 + $0xe0] sm:$0xff]  ;;  %v759_v2 = vshrl.u32 %v3216_v61, 7  ;;  %2176 = vmatprep.subr.bf16.mxu0 %v3217_v8 }
  0x44   : > { %997 = vperm.xlu0 %2254, %v747_v46   ;;  %v710_v16 = vld [vmem:[%s3210_s2 + $0xd8] sm:$0xff]  ;;  %v752_v17 = vpack.c.bf16 %v726_v14, %v725_v13  ;;  %v712_v20 = vld [vmem:[%s3210_s2 + $0xe8] sm:$0xff]  ;;  %v695_v21 = vld [vmem:[%s3210_s2 + $0x60] sm:$0xff]  ;;  %2156 = vmatprep.subr.bf16.mxu1 %v3217_v8 }
  0x45   : > { %v744_v18 = vpack.c.bf16 %v710_v16, %v709_v15  ;;  %v696_v22 = vld [vmem:[%s3210_s2 + $0x68] sm:$0xff]  ;;  %v745_v23 = vpack.c.bf16 %v712_v20, %v711_v19  ;;  %v697_v25 = vld [vmem:[%s3210_s2 + $0x70] sm:$0xff]  ;;  %v698_v26 = vld [vmem:[%s3210_s2 + $0x78] sm:$0xff]  ;;  %v760_v13 = vsub.s32 0, %v759_v2 }
  0x46   : > { %v737_v24 = vpack.c.bf16 %v696_v22, %v695_v21  ;;  %v727_v27 = vld [vmem:[%s3210_s2 + $0x160] sm:$0xff]  ;;  %v728_v28 = vld [vmem:[%s3210_s2 + $0x168] sm:$0xff]  ;;  %v738_v29 = vpack.c.bf16 %v698_v26, %v697_v25  ;;  %v729_v31 = vld [vmem:[%s3210_s2 + $0x170] sm:$0xff] }
  0x47   : > { %881 = vperm.xlu1 %2255, %v741_v51   ;;  %v753_v30 = vpack.c.bf16 %v728_v28, %v727_v27  ;;  %v730_v32 = vld [vmem:[%s3210_s2 + $0x178] sm:$0xff]  ;;  %v713_v33 = vld [vmem:[%s3210_s2 + $0xf0] sm:$0xff]  ;;  %v1391_v39 = vld [vmem:[%s3211_s3] sm:$0xff] }
  0x48   : > { %781 = vperm.xlu0 %2254, %v733_v52   ;;  %v714_v34 = vld [vmem:[%s3210_s2 + $0xf8] sm:$0xff]  ;;  %v754_v35 = vpack.c.bf16 %v730_v32, %v729_v31  ;;  %v1393_v37 = vld [vmem:[%s3211_s3 + $0x10] sm:$0xff]  ;;  %v1392_v40 = vld [vmem:[%s3211_s3 + $0x8] sm:$0xff] }
  0x49   : > { %v746_v36 = vpack.c.bf16 %v714_v34, %v713_v33  ;;  %v1394_v38 = vld [vmem:[%s3211_s3 + $0x18] sm:$0xff]  ;;  %v1407_v42 = vpack.c.bf16 %v1392_v40, %v1391_v39  ;;  %v1397_v43 = vld [vmem:[%s3211_s3 + $0x30] sm:$0xff]  ;;  %v1395_v45 = vld [vmem:[%s3211_s3 + $0x20] sm:$0xff] }
  0x4a   : > { %v1408_v41 = vpack.c.bf16 %v1394_v38, %v1393_v37  ;;  %v1398_v44 = vld [vmem:[%s3211_s3 + $0x38] sm:$0xff]  ;;  %v1396_v46 = vld [vmem:[%s3211_s3 + $0x28] sm:$0xff]  ;;  %v1401_v49 = vld [vmem:[%s3211_s3 + $0x50] sm:$0xff] }
  0x4b   : > { %786 = vperm.xlu1 %2255, %v734_v57   ;;  %v1410_v47 = vpack.c.bf16 %v1398_v44, %v1397_v43  ;;  %v1409_v48 = vpack.c.bf16 %v1396_v46, %v1395_v45  ;;  %v1402_v50 = vld [vmem:[%s3211_s3 + $0x58] sm:$0xff]  ;;  %v1399_v51 = vld [vmem:[%s3211_s3 + $0x40] sm:$0xff]  ;;  %v1400_v52 = vld [vmem:[%s3211_s3 + $0x48] sm:$0xff] }
  0x4c   : > { %1007 = vperm.xlu0 %2254, %v749_v58   ;;  %v1412_v53 = vpack.c.bf16 %v1402_v50, %v1401_v49  ;;  %v1411_v54 = vpack.c.bf16 %v1400_v52, %v1399_v51  ;;  %v1405_v55 = vld [vmem:[%s3211_s3 + $0x70] sm:$0xff]  ;;  %v1406_v56 = vld [vmem:[%s3211_s3 + $0x78] sm:$0xff]  ;;  %v1403_v57 = vld [vmem:[%s3211_s3 + $0x60] sm:$0xff] }
  0x4d   : > { %v1404_v58 = vld [vmem:[%s3211_s3 + $0x68] sm:$0xff]  ;;  %v1414_v59 = vpack.c.bf16 %v1406_v56, %v1405_v55  ;;  %v2672_v1 = vld [vmem:[%s595_s12 + $0x4] sm:$0x7]  ;;  %v2256_v7 = vld [vmem:[%s2664_s10] sm:$0xff]  }
  0x4e   : > { %v1413_v60 = vpack.c.bf16 %v1404_v58, %v1403_v57  ;;  %v2666_v62 = vld [vmem:[%s588_s11] sm:$0x7]  ;;  %2177 = vmatpush3.bf16.msra.mxu0 %v2256_v7  ;;  %v2259_v43 = vld [vmem:[%s2664_s10 + $0x18] sm:$0xff]  }
  0x4f   : > { %1012 = vperm.xlu1 %2255, %v750_v63   ;;  %v2668_v63 = vld [vmem:[%s588_s11 + $0x4] sm:$0x7]  ;;  %v2677_v3 = vpack.c.bf16 %v2666_v62, %v2666_v62  ;;  %2178 = vmatprep.subr.bf16.mxu0 %v3217_v8 }
  0x50   : > { %886 = vperm.xlu0 %2254, %v742_v0   ;;  %v2670_v0 = vld [vmem:[%s595_s12] sm:$0x7]  ;;  %v2681_v4 = vpack.c.bf16 %v2668_v63, %v2668_v63  ;;  %v2257_v14 = vld [vmem:[%s2664_s10 + $0x8] sm:$0xff]   ;;  %v2260_v7 = vld [vmem:[%s2664_s10 + $0x20] sm:$0xff]  }
  0x51   : > { %v855_v9 = vshrl.u32 %v2677_v3, 16  ;;  %v756_v15 = vpack.i.b16 %v2677_v3, %v2677_v3 }
  0x52   : > { %v862_v10 = vshrl.u32 %v2681_v4, 16  ;;  %v763_v16 = vpack.i.b16 %v2681_v4, %v2681_v4  ;;  %2179 = vmatpush3.bf16.msra.mxu0 %v2257_v14 }
  0x53   : > { %891 = vperm.xlu1 %2255, %v743_v5   ;;  %v2685_v5 = vpack.c.bf16 %v2670_v0, %v2670_v0  ;;  %v856_v19 = vpack.i.b16 %v855_v9, %v855_v9  ;;  %2180 = vmatprep.subr.bf16.mxu0 %v3217_v8  ;;  %v2710_v26 = vrot.slane %v756_v15, %v760_v13 }
  0x54   : > { %791 = vperm.xlu0 %2254, %v735_v6   ;;  %v2689_v6 = vpack.c.bf16 %v2672_v1, %v2672_v1  ;;  %v863_v20 = vpack.i.b16 %v862_v10, %v862_v10  ;;  %v2712_v27 = vrot.slane %v763_v16, %v760_v13 }
  0x55   : > { %v2718_v31 = vrot.slane %v856_v19, %v760_v13 }
  0x56   : > { %v2720_v32 = vrot.slane %v863_v20, %v760_v13 }
  0x57   : > { %796 = vperm.xlu1 %2255, %v736_v11   ;;  %v941_v11 = vshrl.u32 %v2685_v5, 16 }
  0x58   : > { %1017 = vperm.xlu0 %2254, %v751_v12   ;;  %v948_v12 = vshrl.u32 %v2689_v6, 16 }
  0x59   : > { %v942_v21 = vpack.i.b16 %v941_v11, %v941_v11 }
  0x5a   : > { %v949_v22 = vpack.i.b16 %v948_v12, %v948_v12 }
  0x5b   : > { %1022 = vperm.xlu1 %2255, %v752_v17   ;;  %v826_v17 = vpack.i.b16 %v2685_v5, %v2685_v5  ;;  %v2722_v33 = vrot.slane %v942_v21, %v760_v13 }
  0x5c   : > { %896 = vperm.xlu0 %2254, %v744_v18   ;;  %v833_v18 = vpack.i.b16 %v2689_v6, %v2689_v6  ;;  %v2724_v34 = vrot.slane %v949_v22, %v760_v13 }
  0x5d   : > { %v2714_v28 = vrot.slane %v826_v17, %v760_v13 }
  0x5f   : > { %901 = vperm.xlu1 %2255, %v745_v23   ;;  %v989_v23 = vsub.s32 1, %v759_v2 }
  0x60   : > { %801 = vperm.xlu0 %2254, %v737_v24   ;;  %v2258_v24 = vld [vmem:[%s2664_s10 + $0x10] sm:$0xff]  }
  0x61   : > { %2181 = vmatpush3.bf16.msra.mxu0 %v2258_v24  ;;  %v2730_v37 = vrot.slane %v826_v17, %v989_v23  ;;  %v2732_v38 = vrot.slane %v833_v18, %v989_v23 }
  0x62   : > { %2182 = vmatprep.subr.bf16.mxu0 %v3217_v8 }
  0x63   : > { %806 = vperm.xlu1 %2255, %v738_v29   ;;  %v2716_v29 = vrot.slane %v833_v18, %v760_v13 }
  0x64   : > { %1027 = vperm.xlu0 %2254, %v753_v30  }
  0x65   : > { %2183 = vmatpush3.bf16.msra.mxu0 %v2259_v43 }
  0x66   : > { %2184 = vmatprep.subr.bf16.mxu0 %v3217_v8 }
  0x67   : > { %1032 = vperm.xlu1 %2255, %v754_v35   ;;  %v2726_v35 = vrot.slane %v756_v15, %v989_v23 }
  0x68   : > { %906 = vperm.xlu0 %2254, %v746_v36   ;;  %v2728_v36 = vrot.slane %v763_v16, %v989_v23 }
  0x69   : > { %2185 = vmatpush3.bf16.msra.mxu0 %v2260_v7 }
  0x6a   : > { %2186 = vmatprep.subr.bf16.mxu0 %v3217_v8 }
  0x6b   : > { %1422 = vperm.xlu1 %2255, %v1408_v41  }
  0x6c   : > { %1417 = vperm.xlu0 %2254, %v1407_v42  }
  0x6f   : > { %1432 = vperm.xlu1 %2255, %v1410_v47  }
  0x70   : > { %1427 = vperm.xlu0 %2254, %v1409_v48  }
  0x73   : > { %1442 = vperm.xlu1 %2255, %v1412_v53  }
  0x74   : > { %1437 = vperm.xlu0 %2254, %v1411_v54  }
  0x77   : > { %1452 = vperm.xlu1 %2255, %v1414_v59  }
  0x78   : > { %1447 = vperm.xlu0 %2254, %v1413_v60  }
  0xba   : > { %v777_v25 = vpop.permute.xlu1 %776 }
  0xbb   : > { %v772_v30 = vpop.permute.xlu0 %771  ;;  %v810_v39 = vmul.bf16 %v777_v25, %v2710_v26  ;;  %v818_v40 = vmul.bf16 %v777_v25, %v2712_v27  ;;  %v840_v41 = vmul.bf16 %v2714_v28, %v777_v25  ;;  %v848_v42 = vmul.bf16 %v2716_v29, %v777_v25 }
  0xbc   : > { %v809_v44 = vmul.bf16 %v772_v30, %v2710_v26  ;;  %v817_v45 = vmul.bf16 %v772_v30, %v2712_v27  ;;  %v839_v46 = vmul.bf16 %v2714_v28, %v772_v30  ;;  %v847_v47 = vmul.bf16 %v2716_v29, %v772_v30 }
  0xbe   : > { %v877_v48 = vpop.permute.xlu1 %876 }
  0xbf   : > { %v910_v49 = vmul.bf16 %v877_v48, %v2718_v31  ;;  %v918_v50 = vmul.bf16 %v877_v48, %v2720_v32  ;;  %v956_v51 = vmul.bf16 %v2722_v33, %v877_v48  ;;  %v964_v52 = vmul.bf16 %v2724_v34, %v877_v48  ;;  %v872_v53 = vpop.permute.xlu0 %871 }
  0xc0   : > { %v909_v54 = vmul.bf16 %v872_v53, %v2718_v31  ;;  %v917_v55 = vmul.bf16 %v872_v53, %v2720_v32  ;;  %v955_v56 = vmul.bf16 %v2722_v33, %v872_v53  ;;  %v963_v57 = vmul.bf16 %v2724_v34, %v872_v53 }
  0xc1   : > { %v926_v58 = vadd.bf16 %v910_v49, %v810_v39  ;;  %v934_v59 = vadd.bf16 %v918_v50, %v818_v40  ;;  %v972_v60 = vadd.bf16 %v956_v51, %v840_v41  ;;  %v980_v2 = vadd.bf16 %v964_v52, %v848_v42  ;;  %v2261_v39 = vld [vmem:[%s2664_s10 + $0x28] sm:$0xff]  }
  0xc2   : > { %v925_v9 = vadd.bf16 %v909_v54, %v809_v44  ;;  %v933_v10 = vadd.bf16 %v917_v55, %v817_v45  ;;  %v971_v11 = vadd.bf16 %v955_v56, %v839_v46  ;;  %v979_v12 = vadd.bf16 %v963_v57, %v847_v47  ;;  %v1003_v13 = vpop.permute.xlu1 %1002  ;;  %2187 = vmatpush3.bf16.msra.mxu0 %v2261_v39  ;;  %v2262_v57 = vld [vmem:[%s2664_s10 + $0x30] sm:$0xff]  }
  0xc3   : > { %v1036_v14 = vmul.bf16 %v1003_v13, %v2726_v35  ;;  %v1044_v15 = vmul.bf16 %v1003_v13, %v2728_v36  ;;  %v1076_v16 = vmul.bf16 %v2730_v37, %v1003_v13  ;;  %v1084_v17 = vmul.bf16 %v2732_v38, %v1003_v13  ;;  %v998_v18 = vpop.permute.xlu0 %997  ;;  %2188 = vmatprep.subr.bf16.mxu0 %v3217_v8 }
  0xc4   : > { %v1035_v19 = vmul.bf16 %v998_v18, %v2726_v35  ;;  %v1043_v20 = vmul.bf16 %v998_v18, %v2728_v36  ;;  %v1075_v21 = vmul.bf16 %v2730_v37, %v998_v18  ;;  %v1083_v22 = vmul.bf16 %v2732_v38, %v998_v18 }
  0xc5   : > { %v2763_v23 = vadd.bf16 %v1036_v14, %v926_v58  ;;  %v2765_v24 = vadd.bf16 %v1044_v15, %v934_v59  ;;  %v2767_v25 = vadd.bf16 %v1076_v16, %v972_v60  ;;  %v2769_v30 = vadd.bf16 %v1084_v17, %v980_v2 }
  0xc6   : > { %v2772_v40 = vadd.bf16 %v1035_v19, %v925_v9  ;;  %v2774_v41 = vadd.bf16 %v1043_v20, %v933_v10  ;;  %v2776_v42 = vadd.bf16 %v1075_v21, %v971_v11  ;;  %v2778_v43 = vadd.bf16 %v1083_v22, %v979_v12  ;;  %v882_v48 = vpop.permute.xlu1 %881  ;;  %2189 = vmatpush3.bf16.msra.mxu0 %v2262_v57  ;;  %v2263_v21 = vld [vmem:[%s2664_s10 + $0x38] sm:$0xff]  }
  0xc7   : > { %3237 = vst [vmem:[#allocation5_spill] sm:$0xff] %v2765_v24  ;;  %3238 = vst [vmem:[#allocation6_spill] sm:$0xff] %v2769_v30  ;;  %v2782_v44 = vmul.bf16 %v2763_v23, %v2763_v23  ;;  %v2786_v45 = vmul.bf16 %v2765_v24, %v2765_v24  ;;  %v2790_v46 = vmul.bf16 %v2767_v25, %v2767_v25  ;;  %v782_v56 = vpop.permute.xlu0 %781  ;;  %2190 = vmatprep.subr.bf16.mxu0 %v3217_v8  ;;  %v3246_v24 = vmov 0.0  }
  0xc8   : > { %3239 = vst [vmem:[#allocation7_spill] sm:$0xff] %v2774_v41  ;;  %3240 = vst [vmem:[#allocation8_spill] sm:$0xff] %v2776_v42  ;;  %v2794_v47 = vmul.bf16 %v2769_v30, %v2769_v30  ;;  %v1107_v49 = vmul.bf16 %v2772_v40, %v2772_v40  ;;  %v1115_v50 = vmul.bf16 %v2774_v41, %v2774_v41  ;;  %2192 = vmatprep.mubr.msk.bf16.mxu0 %vm2322_vm0, %v3246_v24 }
  0xc9   : > { %3241 = vst [vmem:[#allocation9_spill] sm:$0xff] %v2778_v43  ;;  %v1197_v51 = vmul.bf16 %v2776_v42, %v2776_v42  ;;  %v1205_v52 = vmul.bf16 %v2778_v43, %v2778_v43  ;;  %v1125_v53 = vunpack.c.l.bf16 %v2782_v44  ;;  %v1126_v54 = vunpack.c.h.bf16 %v2782_v44  ;;  %2172 = vmatprep.mubr.msk.bf16.mxu1 %vm2322_vm0, %v3246_v24 }
  0xca   : > { %v1141_v55 = vunpack.c.l.bf16 %v2786_v45  ;;  %v1142_v58 = vunpack.c.h.bf16 %v2786_v45  ;;  %v1215_v59 = vunpack.c.l.bf16 %v2790_v46  ;;  %v1216_v60 = vunpack.c.h.bf16 %v2790_v46  ;;  %v2816_v20 = vpop.permute.xlu1 %786  ;;  %2191 = vmatpush3.bf16.msra.mxu0 %v2263_v21 }
  0xcb   : > { %v1231_v2 = vunpack.c.l.bf16 %v2794_v47  ;;  %v1123_v7 = vunpack.c.l.bf16 %v1107_v49  ;;  %v1124_v9 = vunpack.c.h.bf16 %v1107_v49  ;;  %v1139_v10 = vunpack.c.l.bf16 %v1115_v50  ;;  %2196 = vmatprep.subr.bf16.mxu0 %v3217_v8 }
  0xcc   : > { %v1140_v11 = vunpack.c.h.bf16 %v1115_v50  ;;  %v1213_v12 = vunpack.c.l.bf16 %v1197_v51  ;;  %v1214_v13 = vunpack.c.h.bf16 %v1197_v51  ;;  %v1229_v14 = vunpack.c.l.bf16 %v1205_v52 }
  0xcd   : > { %v1230_v15 = vunpack.c.h.bf16 %v1205_v52  ;;  %v1155_v16 = vadd.f32 %v1124_v9, %v1123_v7  ;;  %v911_v18 = vmul.bf16 %v882_v48, %v2718_v31  ;;  %v919_v19 = vmul.bf16 %v882_v48, %v2720_v32  ;;  %v1008_v52 = vpop.permute.xlu0 %1007 }
  0xce   : > { %v1176_v17 = vadd.f32 %v1140_v11, %v1139_v10  ;;  %v1245_v22 = vadd.f32 %v1214_v13, %v1213_v12  ;;  %v957_v44 = vmul.bf16 %v2722_v33, %v882_v48  ;;  %v965_v45 = vmul.bf16 %v2724_v34, %v882_v48 }
  0xcf   : > { %v1266_v39 = vadd.f32 %v1230_v15, %v1229_v14  ;;  %v1232_v46 = vunpack.c.h.bf16 %v2794_v47  ;;  %v1156_v49 = vadd.f32 %v1155_v16, %v1125_v53  ;;  %v811_v50 = vmul.bf16 %v782_v56, %v2710_v26  ;;  %v1013_v16 = vpop.permute.xlu1 %1012 }
  0xd0   : > { %v819_v51 = vmul.bf16 %v782_v56, %v2712_v27  ;;  %v1177_v57 = vadd.f32 %v1176_v17, %v1141_v55  ;;  %v1246_v7 = vadd.f32 %v1245_v22, %v1215_v59  ;;  %v841_v9 = vmul.bf16 %v2714_v28, %v782_v56  ;;  %v2265_v22 = vld [vmem:[%s2664_s10 + $0x40] sm:$0xff]  }
  0xd1   : > { %v849_v10 = vmul.bf16 %v2716_v29, %v782_v56  ;;  %v1267_v11 = vadd.f32 %v1266_v39, %v1231_v2  ;;  %v927_v12 = vadd.bf16 %v911_v18, %v811_v50  ;;  %v812_v47 = vmul.bf16 %v2816_v20, %v2710_v26  ;;  %2157 = vmatpush3.bf16.msra.mxu1 %v2265_v22 }
  0xd2   : > { %v935_v48 = vadd.bf16 %v919_v19, %v819_v51  ;;  %v973_v53 = vadd.bf16 %v957_v44, %v841_v9  ;;  %v820_v14 = vmul.bf16 %v2816_v20, %v2712_v27  ;;  %v842_v55 = vmul.bf16 %v2714_v28, %v2816_v20  ;;  %v887_v51 = vpop.permute.xlu0 %886  ;;  %2158 = vmatprep.subr.bf16.mxu1 %v3217_v8 }
  0xd3   : > { %v981_v13 = vadd.bf16 %v965_v45, %v849_v10  ;;  %v1037_v59 = vmul.bf16 %v1008_v52, %v2726_v35  ;;  %v1045_v56 = vmul.bf16 %v1008_v52, %v2728_v36  ;;  %v1077_v2 = vmul.bf16 %v2730_v37, %v1008_v52  ;;  %v892_v30 = vpop.permute.xlu1 %891 }
  0xd4   : > { %v1085_v15 = vmul.bf16 %v2732_v38, %v1008_v52  ;;  %v850_v17 = vmul.bf16 %v2716_v29, %v2816_v20  ;;  %v1157_v18 = vadd.f32 %v1156_v49, %v1126_v54  ;;  %v1178_v19 = vadd.f32 %v1177_v57, %v1142_v58 }
  0xd5   : > { %v1247_v21 = vadd.f32 %v1246_v7, %v1216_v60  ;;  %v2840_v39 = vadd.bf16 %v1037_v59, %v927_v12  ;;  %v2842_v44 = vadd.bf16 %v1045_v56, %v935_v48  ;;  %v2844_v45 = vadd.bf16 %v1077_v2, %v973_v53  ;;  %v2267_v12 = vld [vmem:[%s2664_s10 + $0x48] sm:$0xff]  }
  0xd6   : > { %v2846_v50 = vadd.bf16 %v1085_v15, %v981_v13  ;;  %v1268_v9 = vadd.f32 %v1267_v11, %v1232_v46  ;;  %v1038_v52 = vmul.bf16 %v1013_v16, %v2726_v35  ;;  %v1046_v10 = vmul.bf16 %v1013_v16, %v2728_v36  ;;  %2159 = vmatpush3.bf16.msra.mxu1 %v2267_v12 }
  0xd7   : > { %3242 = vst [vmem:[#allocation10_spill] sm:$0xff] %v2840_v39  ;;  %3243 = vst [vmem:[#allocation11_spill] sm:$0xff] %v2842_v44  ;;  %v1078_v54 = vmul.bf16 %v2730_v37, %v1013_v16  ;;  %v1109_v58 = vmul.bf16 %v2840_v39, %v2840_v39  ;;  %v1117_v60 = vmul.bf16 %v2842_v44, %v2842_v44  ;;  %2160 = vmatprep.subr.bf16.mxu1 %v3246_v24 }
  0xd8   : > { %3244 = vst [vmem:[#allocation12_spill] sm:$0xff] %v2844_v45  ;;  %3245 = vst [vmem:[#allocation13_spill] sm:$0xff] %v2846_v50  ;;  %v1199_v20 = vmul.bf16 %v2844_v45, %v2844_v45  ;;  %v1207_v49 = vmul.bf16 %v2846_v50, %v2846_v50  ;;  %v912_v46 = vmul.bf16 %v887_v51, %v2718_v31  ;;  %v2269_v45 = vld [vmem:[%s2664_s10 + $0x50] sm:$0xff]  }
  0xd9   : > { %v920_v57 = vmul.bf16 %v887_v51, %v2720_v32  ;;  %v958_v7 = vmul.bf16 %v2722_v33, %v887_v51  ;;  %v966_v11 = vmul.bf16 %v2724_v34, %v887_v51  ;;  %v1127_v48 = vunpack.c.l.bf16 %v1109_v58 }
  0xda   : > { %v1128_v53 = vunpack.c.h.bf16 %v1109_v58  ;;  %v1143_v13 = vunpack.c.l.bf16 %v1117_v60  ;;  %v1086_v59 = vmul.bf16 %v2732_v38, %v1013_v16  ;;  %v1144_v56 = vunpack.c.h.bf16 %v1117_v60  ;;  %2161 = vmatpush3.bf16.msra.mxu1 %v2269_v45  ;;  %v2271_v45 = vld [vmem:[%s2664_s10 + $0x58] sm:$0xff]  }
  0xdb   : > { %v1217_v2 = vunpack.c.l.bf16 %v1199_v20  ;;  %v1218_v15 = vunpack.c.h.bf16 %v1199_v20  ;;  %v1233_v22 = vunpack.c.l.bf16 %v1207_v49  ;;  %v1158_v61 = vadd.f32 %v1157_v18, %v1127_v48  ;;  %v792_v20 = vpop.permute.xlu0 %791  ;;  %2162 = vmatprep.subr.bf16.mxu1 %v3246_v24 }
  0xdc   : > { %v1179_v8 = vadd.f32 %v1178_v19, %v1143_v13  ;;  %v928_v50 = vadd.bf16 %v912_v46, %v812_v47  ;;  %v936_v44 = vadd.bf16 %v920_v57, %v820_v14  ;;  %v974_v41 = vadd.bf16 %v958_v7, %v842_v55 }
  0xdd   : > { %v1248_v51 = vadd.f32 %v1247_v21, %v1217_v2  ;;  %v1269_v43 = vadd.f32 %v1268_v9, %v1233_v22  ;;  %v982_v58 = vadd.bf16 %v966_v11, %v850_v17  ;;  %v1159_v39 = vadd.f32 %v1158_v61, %v1128_v53 }
  0xde   : > { %v1234_v16 = vunpack.c.h.bf16 %v1207_v49  ;;  %v2868_v42 = vadd.bf16 %v1038_v52, %v928_v50  ;;  %v2870_v60 = vadd.bf16 %v1046_v10, %v936_v44  ;;  %v1180_v18 = vadd.f32 %v1179_v8, %v1144_v56  ;;  %2163 = vmatpush3.bf16.msra.mxu1 %v2271_v45 }
  0xdf   : > { %v1249_v19 = vadd.f32 %v1248_v51, %v1218_v15  ;;  %v2872_v47 = vadd.bf16 %v1078_v54, %v974_v41  ;;  %v2874_v14 = vadd.bf16 %v1086_v59, %v982_v58  ;;  %v913_v17 = vmul.bf16 %v892_v30, %v2718_v31  ;;  %v2890_v54 = vpop.permute.xlu1 %796  ;;  %v1018_v13 = vpop.permute.xlu0 %1017  ;;  %2164 = vmatprep.subr.bf16.mxu1 %v3246_v24  ;;  %v2273_v15 = vld [vmem:[%s2664_s10 + $0x60] sm:$0xff]  }
  0xe0   : > { %3247 = vst [vmem:[#allocation14_spill] sm:$0xff] %v2868_v42  ;;  %3248 = vst [vmem:[#allocation15_spill] sm:$0xff] %v2870_v60  ;;  %v1270_v21 = vadd.f32 %v1269_v43, %v1234_v16  ;;  %v1110_v55 = vmul.bf16 %v2868_v42, %v2868_v42  ;;  %v1118_v61 = vmul.bf16 %v2870_v60, %v2870_v60 }
  0xe1   : > { %3249 = vst [vmem:[#allocation16_spill] sm:$0xff] %v2872_v47  ;;  %3250 = vst [vmem:[#allocation17_spill] sm:$0xff] %v2874_v14  ;;  %v1200_v8 = vmul.bf16 %v2872_v47, %v2872_v47  ;;  %v1208_v41 = vmul.bf16 %v2874_v14, %v2874_v14  ;;  %v921_v44 = vmul.bf16 %v892_v30, %v2720_v32 }
  0xe2   : > { %v959_v43 = vmul.bf16 %v2722_v33, %v892_v30  ;;  %v1129_v50 = vunpack.c.l.bf16 %v1110_v55  ;;  %v1130_v9 = vunpack.c.h.bf16 %v1110_v55  ;;  %v1145_v52 = vunpack.c.l.bf16 %v1118_v61  ;;  %2165 = vmatpush3.bf16.msra.mxu1 %v2273_v15  ;;  %v2277_v15 = vld [vmem:[%s2664_s10 + $0x70] sm:$0xff]  }
  0xe3   : > { %v967_v10 = vmul.bf16 %v2724_v34, %v892_v30  ;;  %v1146_v49 = vunpack.c.h.bf16 %v1118_v61  ;;  %v1219_v46 = vunpack.c.l.bf16 %v1200_v8  ;;  %v1220_v57 = vunpack.c.h.bf16 %v1200_v8  ;;  %v1023_v8 = vpop.permute.xlu1 %1022  ;;  %2166 = vmatprep.subr.bf16.mxu1 %v3246_v24 }
  0xe4   : > { %v1235_v7 = vunpack.c.l.bf16 %v1208_v41  ;;  %v1160_v11 = vadd.f32 %v1159_v39, %v1129_v50  ;;  %v1236_v12 = vunpack.c.h.bf16 %v1208_v41  ;;  %v813_v48 = vmul.bf16 %v792_v20, %v2710_v26  ;;  %v2275_v50 = vld [vmem:[%s2664_s10 + $0x68] sm:$0xff]  }
  0xe5   : > { %v821_v53 = vmul.bf16 %v792_v20, %v2712_v27  ;;  %v1181_v59 = vadd.f32 %v1180_v18, %v1145_v52  ;;  %v1250_v56 = vadd.f32 %v1249_v19, %v1219_v46  ;;  %v843_v30 = vmul.bf16 %v2714_v28, %v792_v20 }
  0xe6   : > { %v851_v2 = vmul.bf16 %v2716_v29, %v792_v20  ;;  %v1271_v22 = vadd.f32 %v1270_v21, %v1235_v7  ;;  %v929_v51 = vadd.bf16 %v913_v17, %v813_v48  ;;  %v814_v39 = vmul.bf16 %v2890_v54, %v2710_v26  ;;  %v897_v48 = vpop.permute.xlu0 %896  ;;  %2167 = vmatpush3.bf16.msra.mxu1 %v2275_v50 }
  0xe7   : > { %v937_v58 = vadd.bf16 %v921_v44, %v821_v53  ;;  %v975_v16 = vadd.bf16 %v959_v43, %v843_v30  ;;  %v822_v61 = vmul.bf16 %v2890_v54, %v2712_v27  ;;  %v844_v18 = vmul.bf16 %v2714_v28, %v2890_v54  ;;  %2168 = vmatprep.subr.bf16.mxu1 %v3246_v24  ;;  %v902_v14 = vpop.permute.xlu1 %901 }
  0xe8   : > { %v983_v55 = vadd.bf16 %v967_v10, %v851_v2  ;;  %v1039_v19 = vmul.bf16 %v1018_v13, %v2726_v35  ;;  %v1047_v20 = vmul.bf16 %v1018_v13, %v2728_v36  ;;  %v1079_v21 = vmul.bf16 %v2730_v37, %v1018_v13 }
  0xe9   : > { %v1087_v17 = vmul.bf16 %v2732_v38, %v1018_v13  ;;  %v852_v41 = vmul.bf16 %v2716_v29, %v2890_v54  ;;  %v1161_v44 = vadd.f32 %v1160_v11, %v1130_v9  ;;  %v1182_v43 = vadd.f32 %v1181_v59, %v1146_v49 }
  0xea   : > { %v1251_v45 = vadd.f32 %v1250_v56, %v1220_v57  ;;  %v2912_v52 = vadd.bf16 %v1039_v19, %v929_v51  ;;  %v2914_v10 = vadd.bf16 %v1047_v20, %v937_v58  ;;  %v2916_v46 = vadd.bf16 %v1079_v21, %v975_v16  ;;  %2169 = vmatpush3.bf16.msra.mxu1 %v2277_v15 }
  0xeb   : > { %v2918_v7 = vadd.bf16 %v1087_v17, %v983_v55  ;;  %v1272_v53 = vadd.f32 %v1271_v22, %v1236_v12  ;;  %v1040_v13 = vmul.bf16 %v1023_v8, %v2726_v35  ;;  %v1048_v30 = vmul.bf16 %v1023_v8, %v2728_v36  ;;  %2170 = vmatprep.subr.bf16.mxu1 %v3246_v24 }
  0xec   : > { %3251 = vst [vmem:[#allocation18_spill] sm:$0xff] %v2912_v52  ;;  %3252 = vst [vmem:[#allocation19_spill] sm:$0xff] %v2914_v10  ;;  %v1080_v9 = vmul.bf16 %v2730_v37, %v1023_v8  ;;  %v1111_v54 = vmul.bf16 %v2912_v52, %v2912_v52  ;;  %v1119_v49 = vmul.bf16 %v2914_v10, %v2914_v10  ;;  %v2279_v52 = vld [vmem:[%s2664_s10 + $0x78] sm:$0xff]  }
  0xed   : > { %3253 = vst [vmem:[#allocation20_spill] sm:$0xff] %v2916_v46  ;;  %3254 = vst [vmem:[#allocation21_spill] sm:$0xff] %v2918_v7  ;;  %v1201_v57 = vmul.bf16 %v2916_v46, %v2916_v46  ;;  %v1209_v11 = vmul.bf16 %v2918_v7, %v2918_v7  ;;  %v914_v12 = vmul.bf16 %v897_v48, %v2718_v31 }
  0xee   : > { %v922_v59 = vmul.bf16 %v897_v48, %v2720_v32  ;;  %v960_v56 = vmul.bf16 %v2722_v33, %v897_v48  ;;  %v968_v2 = vmul.bf16 %v2724_v34, %v897_v48  ;;  %v1131_v22 = vunpack.c.l.bf16 %v1111_v54  ;;  %2171 = vmatpush3.bf16.msra.mxu1 %v2279_v52 }
  0xef   : > { %v1132_v51 = vunpack.c.h.bf16 %v1111_v54  ;;  %v1147_v58 = vunpack.c.l.bf16 %v1119_v49  ;;  %v1088_v16 = vmul.bf16 %v2732_v38, %v1023_v8  ;;  %v1148_v55 = vunpack.c.h.bf16 %v1119_v49 }
  0xf0   : > { %v1221_v19 = vunpack.c.l.bf16 %v1201_v57  ;;  %v1222_v20 = vunpack.c.h.bf16 %v1201_v57  ;;  %v1237_v21 = vunpack.c.l.bf16 %v1209_v11  ;;  %v1162_v17 = vadd.f32 %v1161_v44, %v1131_v22  ;;  %v802_v57 = vpop.permute.xlu0 %801 }
  0xf1   : > { %v1183_v50 = vadd.f32 %v1182_v43, %v1147_v58  ;;  %v930_v7 = vadd.bf16 %v914_v12, %v814_v39  ;;  %v938_v10 = vadd.bf16 %v922_v59, %v822_v61  ;;  %v976_v46 = vadd.bf16 %v960_v56, %v844_v18 }
  0xf2   : > { %v1252_v48 = vadd.f32 %v1251_v45, %v1221_v19  ;;  %v1273_v60 = vadd.f32 %v1272_v53, %v1237_v21  ;;  %v984_v54 = vadd.bf16 %v968_v2, %v852_v41  ;;  %v1163_v47 = vadd.f32 %v1162_v17, %v1132_v51 }
  0xf3   : > { %v1238_v8 = vunpack.c.h.bf16 %v1209_v11  ;;  %v2940_v42 = vadd.bf16 %v1040_v13, %v930_v7  ;;  %v2942_v49 = vadd.bf16 %v1048_v30, %v938_v10  ;;  %v1184_v15 = vadd.f32 %v1183_v50, %v1148_v55 }
  0xf4   : > { %v1253_v44 = vadd.f32 %v1252_v48, %v1222_v20  ;;  %v2944_v43 = vadd.bf16 %v1080_v9, %v976_v46  ;;  %v2946_v39 = vadd.bf16 %v1088_v16, %v984_v54  ;;  %v915_v45 = vmul.bf16 %v902_v14, %v2718_v31  ;;  %v2960_v9 = vpop.permute.xlu1 %806  ;;  %v1028_v16 = vpop.permute.xlu0 %1027 }
  0xf5   : > { %v1274_v61 = vadd.f32 %v1273_v60, %v1238_v8  ;;  %v1112_v18 = vmul.bf16 %v2940_v42, %v2940_v42  ;;  %v1120_v41 = vmul.bf16 %v2942_v49, %v2942_v49  ;;  %v923_v46 = vmul.bf16 %v902_v14, %v2720_v32 }
  0xf6   : > { %v1202_v10 = vmul.bf16 %v2944_v43, %v2944_v43  ;;  %v1210_v7 = vmul.bf16 %v2946_v39, %v2946_v39  ;;  %v961_v53 = vmul.bf16 %v2722_v33, %v902_v14  ;;  %v969_v30 = vmul.bf16 %v2724_v34, %v902_v14 }
  0xf7   : > { %v1133_v52 = vunpack.c.l.bf16 %v1112_v18  ;;  %v1134_v60 = vunpack.c.h.bf16 %v1112_v18  ;;  %v1149_v13 = vunpack.c.l.bf16 %v1120_v41  ;;  %v1150_v11 = vunpack.c.h.bf16 %v1120_v41 }
  0xf8   : > { %v1223_v12 = vunpack.c.l.bf16 %v1202_v10  ;;  %v1224_v59 = vunpack.c.h.bf16 %v1202_v10  ;;  %v1239_v56 = vunpack.c.l.bf16 %v1210_v7  ;;  %v1240_v22 = vunpack.c.h.bf16 %v1210_v7  ;;  %v1033_v41 = vpop.permute.xlu1 %1032 }
  0xf9   : > { %v1164_v2 = vadd.f32 %v1163_v47, %v1133_v52  ;;  %v815_v51 = vmul.bf16 %v802_v57, %v2710_v26  ;;  %v823_v58 = vmul.bf16 %v802_v57, %v2712_v27  ;;  %v1185_v55 = vadd.f32 %v1184_v15, %v1149_v13  ;;  %v907_v52 = vpop.permute.xlu0 %906 }
  0xfa   : > { %v1254_v19 = vadd.f32 %v1253_v44, %v1223_v12  ;;  %v845_v20 = vmul.bf16 %v2714_v28, %v802_v57  ;;  %v853_v21 = vmul.bf16 %v2716_v29, %v802_v57  ;;  %v1275_v14 = vadd.f32 %v1274_v61, %v1239_v56 }
  0xfb   : > { %v931_v17 = vadd.bf16 %v915_v45, %v815_v51  ;;  %v939_v50 = vadd.bf16 %v923_v46, %v823_v58  ;;  %v816_v48 = vmul.bf16 %v2960_v9, %v2710_v26  ;;  %v824_v8 = vmul.bf16 %v2960_v9, %v2712_v27 }
  0xfc   : > { %v977_v54 = vadd.bf16 %v961_v53, %v845_v20  ;;  %v985_v47 = vadd.bf16 %v969_v30, %v853_v21  ;;  %v846_v18 = vmul.bf16 %v2714_v28, %v2960_v9  ;;  %v1041_v15 = vmul.bf16 %v1028_v16, %v2726_v35 }
  0xfd   : > { %v1049_v44 = vmul.bf16 %v1028_v16, %v2728_v36  ;;  %v1081_v57 = vmul.bf16 %v2730_v37, %v1028_v16  ;;  %v1089_v61 = vmul.bf16 %v2732_v38, %v1028_v16  ;;  %v854_v26 = vmul.bf16 %v2716_v29, %v2960_v9 }
  0xfe   : > { %v1165_v45 = vadd.f32 %v1164_v2, %v1134_v60  ;;  %v1186_v10 = vadd.f32 %v1185_v55, %v1150_v11  ;;  %v1255_v7 = vadd.f32 %v1254_v19, %v1224_v59  ;;  %v2978_v46 = vadd.bf16 %v1041_v15, %v931_v17 }
  0xff   : > { %v2980_v27 = vadd.bf16 %v1049_v44, %v939_v50  ;;  %v2982_v28 = vadd.bf16 %v1081_v57, %v977_v54  ;;  %v2984_v53 = vadd.bf16 %v1089_v61, %v985_v47  ;;  %v1276_v13 = vadd.f32 %v1275_v14, %v1240_v22 }
 0x100   : > { %v1042_v30 = vmul.bf16 %v1033_v41, %v2726_v35  ;;  %v1050_v12 = vmul.bf16 %v1033_v41, %v2728_v36  ;;  %v1082_v56 = vmul.bf16 %v2730_v37, %v1033_v41  ;;  %v1113_v29 = vmul.bf16 %v2978_v46, %v2978_v46 }
 0x101   : > { %v1121_v60 = vmul.bf16 %v2980_v27, %v2980_v27  ;;  %v1203_v9 = vmul.bf16 %v2982_v28, %v2982_v28  ;;  %v1211_v11 = vmul.bf16 %v2984_v53, %v2984_v53  ;;  %v916_v59 = vmul.bf16 %v907_v52, %v2718_v31 }
 0x102   : > { %v924_v35 = vmul.bf16 %v907_v52, %v2720_v32  ;;  %v962_v36 = vmul.bf16 %v2722_v33, %v907_v52  ;;  %v970_v37 = vmul.bf16 %v2724_v34, %v907_v52  ;;  %v1135_v2 = vunpack.c.l.bf16 %v1113_v29 }
 0x103   : > { %v1136_v22 = vunpack.c.h.bf16 %v1113_v29  ;;  %v1151_v51 = vunpack.c.l.bf16 %v1121_v60  ;;  %v1090_v58 = vmul.bf16 %v2732_v38, %v1033_v41  ;;  %v1152_v16 = vunpack.c.h.bf16 %v1121_v60 }
 0x104   : > { %v1225_v55 = vunpack.c.l.bf16 %v1203_v9  ;;  %v1226_v19 = vunpack.c.h.bf16 %v1203_v9  ;;  %v1241_v20 = vunpack.c.l.bf16 %v1211_v11  ;;  %v1166_v21 = vadd.f32 %v1165_v45, %v1135_v2 }
 0x105   : > { %v1187_v14 = vadd.f32 %v1186_v10, %v1151_v51  ;;  %v932_v17 = vadd.bf16 %v916_v59, %v816_v48  ;;  %v940_v50 = vadd.bf16 %v924_v35, %v824_v8  ;;  %v978_v32 = vadd.bf16 %v962_v36, %v846_v18 }
 0x106   : > { %v1256_v31 = vadd.f32 %v1255_v7, %v1225_v55  ;;  %v1277_v54 = vadd.f32 %v1276_v13, %v1241_v20  ;;  %v986_v47 = vadd.bf16 %v970_v37, %v854_v26  ;;  %v1167_v33 = vadd.f32 %v1166_v21, %v1136_v22 }
 0x107   : > { %v1242_v15 = vunpack.c.h.bf16 %v1211_v11  ;;  %v3002_v34 = vadd.bf16 %v1042_v30, %v932_v17  ;;  %v3004_v44 = vadd.bf16 %v1050_v12, %v940_v50  ;;  %v1188_v57 = vadd.f32 %v1187_v14, %v1152_v16 }
 0x108   : > { %v1257_v38 = vadd.f32 %v1256_v31, %v1226_v19  ;;  %v3006_v61 = vadd.bf16 %v1082_v56, %v978_v32  ;;  %v3008_v41 = vadd.bf16 %v1090_v58, %v986_v47  ;;  %v3021_v10 = vunpack.c.l.b16 %v2677_v3 }
 0x109   : > { %v1278_v45 = vadd.f32 %v1277_v54, %v1242_v15  ;;  %v1114_v48 = vmul.bf16 %v3002_v34, %v3002_v34  ;;  %v1122_v8 = vmul.bf16 %v3004_v44, %v3004_v44  ;;  %v3024_v7 = vunpack.c.l.b16 %v2681_v4  ;;  %v2264_v54 = vld [vmem:[%s2664_s10 + $0x80] sm:$0xff]  }
 0x10a   : > { %v1204_v18 = vmul.bf16 %v3006_v61, %v3006_v61  ;;  %v1212_v26 = vmul.bf16 %v3008_v41, %v3008_v41  ;;  %v3029_v12 = vunpack.c.l.b16 %v2685_v5  ;;  %v3032_v35 = vunpack.c.l.b16 %v2689_v6 }
 0x10b   : > { %v1137_v52 = vunpack.c.l.bf16 %v1114_v48  ;;  %v1138_v13 = vunpack.c.h.bf16 %v1114_v48  ;;  %v1153_v30 = vunpack.c.l.bf16 %v1122_v8  ;;  %v1154_v56 = vunpack.c.h.bf16 %v1122_v8 }
 0x10c   : > { %v1227_v29 = vunpack.c.l.bf16 %v1204_v18  ;;  %v1228_v60 = vunpack.c.h.bf16 %v1204_v18  ;;  %v1243_v9 = vunpack.c.l.bf16 %v1212_v26  ;;  %v1244_v3 = vunpack.c.h.bf16 %v1212_v26  ;;  %v2266_v26 = vld [vmem:[%s2664_s10 + $0x88] sm:$0xff]  }
 0x10d   : > { %v1168_v11 = vadd.f32 %v1167_v33, %v1137_v52  ;;  %v1189_v59 = vadd.f32 %v1188_v57, %v1153_v30  ;;  %v1683_v5 = vrot.slane %v3024_v7, 7  ;;  %v1685_v22 = vrot.slane %v3029_v12, 6 }
 0x10e   : > { %v1258_v4 = vadd.f32 %v1257_v38, %v1227_v29  ;;  %v1279_v36 = vadd.f32 %v1278_v45, %v1243_v9  ;;  %v1687_v16 = vrot.slane %v3032_v35, 5  ;;  %v1584_v57 = vrot.slane %v3021_v10, 1 }
 0x10f   : > { %v1169_v37 = vadd.f32 %v1168_v11, %v1138_v13  ;;  %v1190_v2 = vadd.f32 %v1189_v59, %v1154_v56  ;;  %v1684_v6 = vsel %vm1585_vm1, %v1683_v5, %v3021_v10  ;;  %v1587_v48 = vrot.slane %v3029_v12, 7 }
 0x110   : > { %v1259_v51 = vadd.f32 %v1258_v4, %v1228_v60  ;;  %v1280_v58 = vadd.f32 %v1279_v36, %v1244_v3  ;;  %v1686_v14 = vsel %vm1588_vm2, %v1685_v22, %v1684_v6  ;;  %v1586_v52 = vsel %vm1585_vm1, %v3024_v7, %v1584_v57  ;;  %v2272_v6 = vld [vmem:[%s2664_s10 + $0xa0] sm:$0xff]  }
 0x111   : > { %v1170_v55 = vrot.slane %v1169_v37, 4  ;;  %v1191_v19 = vrot.slane %v1190_v2, 4  ;;  %v1688_v31 = vsel %vm1591_vm3, %v1687_v16, %v1686_v14  ;;  %v1590_v13 = vrot.slane %v3032_v35, 6 }
 0x112   : > { %v1260_v20 = vrot.slane %v1259_v51, 4  ;;  %v1281_v21 = vrot.slane %v1280_v58, 4  ;;  %v1689_v33 = vpack.c.b16 %v1688_v31, %v1688_v31  ;;  %v1589_v56 = vsel %vm1588_vm2, %v1587_v48, %v1586_v52 }
 0x113   : > { %v1171_v17 = vadd.f32 %v1170_v55, %v1169_v37  ;;  %v1192_v50 = vadd.f32 %v1191_v19, %v1190_v2  ;;  %v662_v29 = vsub.f32 %v2666_v62, %v2670_v0  ;;  %v1592_v9 = vsel %vm1591_vm3, %v1590_v13, %v1589_v56  ;;  %v2268_v2 = vld [vmem:[%s2664_s10 + $0x90] sm:$0xff]  }
 0x114   : > { %v1261_v32 = vadd.f32 %v1260_v20, %v1259_v51  ;;  %v1282_v47 = vadd.f32 %v1281_v21, %v1280_v58  ;;  %2193 = vmatmul.mubr.bf16.vlgmr.msra.gmra.mrb[0].mxu0 %v1689_v33  ;;  %v663_v11 = vsub.f32 %v2668_v63, %v2672_v1  ;;  %v1593_v4 = vpack.c.b16 %v1592_v9, %v1592_v9  ;;  %v2270_v63 = vld [vmem:[%s2664_s10 + $0x98] sm:$0xff]  }
 0x115   : > { %v1172_v15 = vrot.slane %v1171_v17, 2  ;;  %v1193_v38 = vrot.slane %v1192_v50, 2  ;;  %2197 = vmatpush3.bf16.msra.mxu0 %v2264_v54  ;;  %2212 = vmatprep.mubr.msk.bf16.mxu0 %vm2322_vm0, %v3246_v24  ;;  %v664_v5 = vmul.f32 %v662_v29, %v662_v29  ;;  %v1796_v20 = vrot.slane %v3021_v10, 2 }
 0x116   : > { %v1262_v45 = vrot.slane %v1261_v32, 2  ;;  %v1283_v18 = vrot.slane %v1282_v47, 2  ;;  %2198 = vmatprep.subr.bf16.mxu0 %v3246_v24  ;;  %2173 = vmatmul.mubr.bf16.vlgmr.msra.gmra.mrb[0].mxu1 %v1593_v4  ;;  %v665_v62 = vmul.f32 %v663_v11, %v663_v11  ;;  %v1797_v21 = vrot.slane %v3024_v7, 1 }
 0x117   : > { %v1173_v8 = vadd.f32 %v1172_v15, %v1171_v17  ;;  %v1194_v59 = vadd.f32 %v1193_v38, %v1192_v50  ;;  %v667_v1 = vsel %vm666_vm4, %v664_v5, 0.0  ;;  %v2274_v17 = vld [vmem:[%s2664_s10 + $0xa8] sm:$0xff]   ;;  %v2276_v15 = vld [vmem:[%s2664_s10 + $0xb0] sm:$0xff]   ;;  %v1800_v57 = vrot.slane %v3032_v35, 7 }
 0x118   : > { %v1263_v30 = vadd.f32 %v1262_v45, %v1261_v32  ;;  %v1284_v37 = vadd.f32 %v1283_v18, %v1282_v47  ;;  %v668_v58 = vsel %vm666_vm4, %v665_v62, 0.0  ;;  %v1798_v32 = vsel %vm1585_vm1, %v1797_v21, %v1796_v20 }
 0x119   : > { %v1174_v60 = vrot.slane %v1173_v8, 1  ;;  %2199 = vmatpush3.bf16.msra.mxu0 %v2266_v26  ;;  %v1195_v0 = vrot.slane %v1194_v59, 1  ;;  %v669_v55 = vadd.f32 %v668_v58, %v667_v1  ;;  %v1799_v48 = vsel %vm1588_vm2, %v3029_v12, %v1798_v32  ;;  %v2278_v26 = vld [vmem:[%s2664_s10 + $0xb8] sm:$0xff]  }
 0x11a   : > { %v1264_v3 = vrot.slane %v1263_v30, 1  ;;  %2200 = vmatprep.subr.bf16.mxu0 %v3246_v24  ;;  %v1285_v51 = vrot.slane %v1284_v37, 1  ;;  %v1801_v52 = vsel %vm1591_vm3, %v1800_v57, %v1799_v48 }
 0x11b   : > { %v1175_v36 = vadd.f32 %v1174_v60, %v1173_v8  ;;  %v1196_v16 = vadd.f32 %v1195_v0, %v1194_v59  ;;  %670 = vadd.xlane.f32.xlu0 %v669_v55  ;;  %v3255_v0 = vld [vmem:[#allocation8_spill] sm:$0xff] }
 0x11c   : > { %v1265_v22 = vadd.f32 %v1264_v3, %v1263_v30  ;;  %v1286_v19 = vadd.f32 %v1285_v51, %v1284_v37  ;;  %v1802_v30 = vpack.c.b16 %v1801_v52, %v1801_v52 }
 0x11d   : > { %2280 = vrsqrt.f32 %v1175_v36  ;;  %2201 = vmatpush3.bf16.msra.mxu0 %v2268_v2  ;;  %vm1289_vm5 = vcmp.eq.f32.partialorder %v1175_v36, inf  ;;  %v1292_v54 = vand.u32 2147483648, %v1175_v36  ;;  %vm1291_vm6 = vcmp.eq.f32.partialorder %v1175_v36, 0.0 }
 0x11e   : > { %2282 = vrsqrt.f32 %v1265_v22  ;;  %2202 = vmatprep.subr.bf16.mxu0 %v3246_v24  ;;  %vm1309_vm7 = vcmp.eq.f32.partialorder %v1265_v22, inf  ;;  %v1312_v10 = vand.u32 2147483648, %v1265_v22  ;;  %vm1311_vm8 = vcmp.eq.f32.partialorder %v1265_v22, 0.0 }
 0x11f   : > { %2284 = vrsqrt.f32 %v1196_v16  ;;  %vm1296_vm9 = vcmp.eq.f32.partialorder %v1196_v16, inf  ;;  %vm1316_vm10 = vcmp.eq.f32.partialorder %v1286_v19, inf  ;;  %v1299_v9 = vand.u32 2147483648, %v1196_v16 }
 0x120   : > { %2286 = vrsqrt.f32 %v1286_v19  ;;  %vm1298_vm11 = vcmp.eq.f32.partialorder %v1196_v16, 0.0  ;;  %v1319_v59 = vand.u32 2147483648, %v1286_v19  ;;  %vm1318_vm12 = vcmp.eq.f32.partialorder %v1286_v19, 0.0 }
 0x121   : > { %2203 = vmatpush3.bf16.msra.mxu0 %v2270_v63  ;;  %v3256_v63 = vld [vmem:[#allocation10_spill] sm:$0xff] }
 0x122   : > { %2204 = vmatprep.subr.bf16.mxu0 %v3246_v24 }
 0x125   : > { %2205 = vmatpush3.bf16.msra.mxu0 %v2272_v6 }
 0x126   : > { %2206 = vmatprep.subr.bf16.mxu0 %v3246_v24 }
 0x127   : > { %v2281_v14 = vpop.eup %2280 }
 0x128   : > { %v1288_v50 = vmul.f32 %v2281_v14, %v1175_v36  ;;  %v2283_v31 = vpop.eup %2282  ;;  %v3096_v14 = vpop.permute.xlu0 %1417 }
 0x129   : > { %v1308_v33 = vmul.f32 %v2283_v31, %v1265_v22  ;;  %2207 = vmatpush3.bf16.msra.mxu0 %v2274_v17  ;;  %v2285_v13 = vpop.eup %2284  ;;  %v3098_v31 = vpop.permute.xlu1 %1422 }
 0x12a   : > { %v1290_v47 = vsel %vm1289_vm5, %v1175_v36, %v1288_v50  ;;  %2208 = vmatprep.subr.bf16.mxu0 %v3246_v24  ;;  %v2287_v35 = vpop.eup %2286  ;;  %v1295_v56 = vmul.f32 %v2285_v13, %v1196_v16 }
 0x12b   : > { %v1293_v7 = vsel %vm1291_vm6, %v1292_v54, %v1290_v47  ;;  %v1310_v38 = vsel %vm1309_vm7, %v1265_v22, %v1308_v33  ;;  %v1315_v29 = vmul.f32 %v2287_v35, %v1286_v19 }
 0x12c   : > { %v1301_v45 = vadd.f32 1e-10, %v1293_v7  ;;  %v1313_v8 = vsel %vm1311_vm8, %v1312_v10, %v1310_v38  ;;  %v1297_v60 = vsel %vm1296_vm9, %v1196_v16, %v1295_v56  ;;  %v3257_v16 = vld [vmem:[#allocation14_spill] sm:$0xff] }
 0x12d   : > { %v1321_v18 = vadd.f32 1e-10, %v1313_v8  ;;  %2209 = vmatpush3.bf16.msra.mxu0 %v2276_v15  ;;  %v1317_v11 = vsel %vm1316_vm10, %v1286_v19, %v1315_v29  ;;  %v1300_v36 = vsel %vm1298_vm11, %v1299_v9, %v1297_v60  ;;  %v3109_v13 = vpop.permute.xlu1 %1432  ;;  %v3260_v60 = vld [vmem:[#allocation18_spill] sm:$0xff] }
 0x12e   : > { %2288 = vrcp.f32 %v1301_v45  ;;  %2210 = vmatprep.subr.bf16.mxu0 %v3246_v24  ;;  %v1320_v24 = vsel %vm1318_vm12, %v1319_v59, %v1317_v11  ;;  %v1302_v22 = vadd.f32 1e-10, %v1300_v36  ;;  %v3102_v45 = vpop.permute.xlu0 %1427  ;;  %v3261_v59 = vld [vmem:[#allocation20_spill] sm:$0xff] }
 0x12f   : > { %2290 = vrcp.f32 %v1321_v18  ;;  %v1322_v58 = vadd.f32 1e-10, %v1320_v24 }
 0x130   : > { %2292 = vrcp.f32 %v1302_v22 }
 0x131   : > { %2211 = vmatpush3.bf16.msra.mxu0 %v2278_v26  ;;  %2294 = vrcp.f32 %v1322_v58 }
 0x134   : > { %2213 = vmatmul.mubr.bf16.vlgmr.msra.gmra.mrb[0].mxu0 %v1802_v30 }
 0x138   : > { %v2289_v12 = vpop.eup %2288 }
 0x139   : > { %v3076_v3 = vpack.c.bf16 %v2289_v12, %v2289_v12  ;;  %v2291_v4 = vpop.eup %2290 }
 0x13a   : > { %v3078_v37 = vpack.c.bf16 %v2291_v4, %v2291_v4  ;;  %v2293_v35 = vpop.eup %2292 }
 0x13b   : > { %v1328_v2 = vmul.bf16 %v3076_v3, %v2763_v23  ;;  %v1327_v5 = vmul.bf16 %v3076_v3, %v2772_v40  ;;  %v1329_v1 = vmul.bf16 %v3076_v3, %v3256_v63  ;;  %v1330_v55 = vmul.bf16 %v3076_v3, %v3257_v16  ;;  %v3258_v23 = vld [vmem:[#allocation16_spill] sm:$0xff]  ;;  %v2295_v9 = vpop.eup %2294  ;;  %v3124_v16 = vpop.permute.xlu0 %1437 }
 0x13c   : > { %v1344_v62 = vmul.bf16 %v3078_v37, %v2767_v25  ;;  %v1343_v51 = vmul.bf16 %v3078_v37, %v3255_v0  ;;  %v1346_v20 = vmul.bf16 %v3078_v37, %v3258_v23  ;;  %v3259_v40 = vld [vmem:[#allocation12_spill] sm:$0xff]  ;;  %v1332_v8 = vmul.bf16 %v3076_v3, %v2940_v42 }
 0x13d   : > { %v1345_v21 = vmul.bf16 %v3078_v37, %v3259_v40  ;;  %v1348_v52 = vmul.bf16 %v3078_v37, %v2944_v43  ;;  %v1331_v12 = vmul.bf16 %v3076_v3, %v3260_v60  ;;  %v1347_v42 = vmul.bf16 %v3078_v37, %v3261_v59 }
 0x13e   : > { %v1360_v19 = vsub.bf16 %v1328_v2, %v1344_v62  ;;  %v1359_v6 = vsub.bf16 %v1327_v5, %v1343_v51  ;;  %v1362_v47 = vsub.bf16 %v1330_v55, %v1346_v20  ;;  %v3116_v2 = vpack.c.bf16 %v2293_v35, %v2293_v35  ;;  %v3263_v20 = vld [vmem:[#allocation9_spill] sm:$0xff] }
 0x13f   : > { %v1361_v50 = vsub.bf16 %v1329_v1, %v1345_v21  ;;  %v1364_v11 = vsub.bf16 %v1332_v8, %v1348_v52  ;;  %v1363_v24 = vsub.bf16 %v1331_v12, %v1347_v42  ;;  %v3118_v43 = vpack.c.bf16 %v2295_v9, %v2295_v9  ;;  %v3133_v21 = vpop.permute.xlu1 %1442  ;;  %v3142_v8 = vpop.permute.xlu0 %1447  ;;  %v3266_v52 = vld [vmem:[#allocation11_spill] sm:$0xff] }
 0x140   : > { %v1376_v25 = vmul.bf16 %v1360_v19, %v1360_v19  ;;  %v1375_v17 = vmul.bf16 %v1359_v6, %v1359_v6  ;;  %v1378_v38 = vmul.bf16 %v1362_v47, %v1362_v47  ;;  %v1334_v51 = vmul.bf16 %v3076_v3, %v3002_v34  ;;  %v3262_v6 = vld [vmem:[#allocation7_spill] sm:$0xff] }
 0x141   : > { %v1377_v33 = vmul.bf16 %v1361_v50, %v1361_v50  ;;  %v1380_v62 = vmul.bf16 %v1364_v11, %v1364_v11  ;;  %v1379_v0 = vmul.bf16 %v1363_v24, %v1363_v24  ;;  %v1350_v63 = vmul.bf16 %v3078_v37, %v3006_v61 }
 0x142   : > { %v1456_v54 = vmul.bf16 %v3098_v31, %v1376_v25  ;;  %v1455_v32 = vmul.bf16 %v3096_v14, %v1375_v17  ;;  %v1458_v30 = vmul.bf16 %v3109_v13, %v1378_v38  ;;  %v1333_v55 = vmul.bf16 %v3076_v3, %v2978_v46 }
 0x143   : > { %v1457_v48 = vmul.bf16 %v3102_v45, %v1377_v33  ;;  %v1459_v19 = vmul.bf16 %v3124_v16, %v1379_v0  ;;  %v1335_v23 = vmul.bf16 %v3116_v2, %v3262_v6  ;;  %v1351_v40 = vmul.bf16 %v3118_v43, %v3263_v20  ;;  %v3265_v33 = vld [vmem:[#allocation6_spill] sm:$0xff]  ;;  %v3270_v20 = vld [vmem:[#allocation19_spill] sm:$0xff] }
 0x144   : > { %v1471_v10 = vunpack.c.l.bf16 %v1455_v32  ;;  %v1472_v7 = vunpack.c.h.bf16 %v1455_v32  ;;  %v1473_v15 = vunpack.c.l.bf16 %v1456_v54  ;;  %v1474_v18 = vunpack.c.h.bf16 %v1456_v54  ;;  %v3264_v32 = vld [vmem:[#allocation5_spill] sm:$0xff] }
 0x145   : > { %v1475_v56 = vunpack.c.l.bf16 %v1457_v48  ;;  %v1476_v4 = vunpack.c.h.bf16 %v1457_v48  ;;  %v1477_v5 = vunpack.c.l.bf16 %v1458_v30  ;;  %v1478_v1 = vunpack.c.h.bf16 %v1458_v30  ;;  %v3267_v30 = vld [vmem:[#allocation13_spill] sm:$0xff] }
 0x146   : > { %v1503_v57 = vadd.f32 %v1472_v7, %v1471_v10  ;;  %v1349_v61 = vmul.bf16 %v3078_v37, %v2982_v28  ;;  %v1460_v25 = vmul.bf16 %v3133_v21, %v1380_v62  ;;  %v1479_v17 = vunpack.c.l.bf16 %v1459_v19 }
 0x147   : > { %v1366_v50 = vsub.bf16 %v1334_v51, %v1350_v63  ;;  %v1480_v46 = vunpack.c.h.bf16 %v1459_v19  ;;  %v1336_v47 = vmul.bf16 %v3116_v2, %v3264_v32  ;;  %v1352_v10 = vmul.bf16 %v3118_v43, %v3265_v33 }
 0x148   : > { %v1504_v26 = vadd.f32 %v1503_v57, %v1473_v15  ;;  %v1365_v54 = vsub.bf16 %v1333_v55, %v1349_v61  ;;  %v1367_v7 = vsub.bf16 %v1335_v23, %v1351_v40  ;;  %v1481_v15 = vunpack.c.l.bf16 %v1460_v25 }
 0x149   : > { %v1382_v38 = vmul.bf16 %v1366_v50, %v1366_v50  ;;  %v1482_v28 = vunpack.c.h.bf16 %v1460_v25  ;;  %v1337_v35 = vmul.bf16 %v3116_v2, %v3266_v52  ;;  %v1339_v40 = vmul.bf16 %v3116_v2, %v3270_v20 }
 0x14a   : > { %v1505_v29 = vadd.f32 %v1504_v26, %v1474_v18  ;;  %v1381_v48 = vmul.bf16 %v1365_v54, %v1365_v54  ;;  %v1368_v26 = vsub.bf16 %v1336_v47, %v1352_v10  ;;  %v1383_v60 = vmul.bf16 %v1367_v7, %v1367_v7 }
 0x14c   : > { %v1506_v36 = vadd.f32 %v1505_v29, %v1475_v56  ;;  %v1461_v18 = vmul.bf16 %v3142_v8, %v1381_v48  ;;  %v1353_v56 = vmul.bf16 %v3118_v43, %v3267_v30  ;;  %v3149_v29 = vpop.permute.xlu1 %1452  ;;  %v1463_v0 = vmul.bf16 %v3096_v14, %v1383_v60 }
 0x14d   : > { %v1462_v12 = vmul.bf16 %v3149_v29, %v1382_v38  ;;  %v1341_v48 = vmul.bf16 %v3116_v2, %v2980_v27 }
 0x14e   : > { %v1507_v22 = vadd.f32 %v1506_v36, %v1476_v4  ;;  %v1483_v9 = vunpack.c.l.bf16 %v1461_v18  ;;  %v1484_v59 = vunpack.c.h.bf16 %v1461_v18  ;;  %v1384_v4 = vmul.bf16 %v1368_v26, %v1368_v26  ;;  %v3268_v36 = vld [vmem:[#allocation15_spill] sm:$0xff] }
 0x14f   : > { %v1338_v24 = vmul.bf16 %v3116_v2, %v3268_v36  ;;  %v1369_v62 = vsub.bf16 %v1337_v35, %v1353_v56  ;;  %v1485_v51 = vunpack.c.l.bf16 %v1462_v12  ;;  %v1487_v23 = vunpack.c.l.bf16 %v1463_v0 }
 0x150   : > { %v1508_v58 = vadd.f32 %v1507_v22, %v1477_v5  ;;  %v3269_v5 = vld [vmem:[#allocation17_spill] sm:$0xff]  ;;  %v1464_v55 = vmul.bf16 %v3098_v31, %v1384_v4  ;;  %v1356_v31 = vmul.bf16 %v3118_v43, %v2946_v39  ;;  %v1342_v26 = vmul.bf16 %v3116_v2, %v3004_v44 }
 0x151   : > { %v1354_v22 = vmul.bf16 %v3118_v43, %v3269_v5  ;;  %v1385_v6 = vmul.bf16 %v1369_v62, %v1369_v62 }
 0x152   : > { %v1509_v34 = vadd.f32 %v1508_v58, %v1478_v1  ;;  %v1486_v1 = vunpack.c.h.bf16 %v1462_v12  ;;  %v1490_v33 = vunpack.c.h.bf16 %v1464_v55 }
 0x153   : > { %v1370_v19 = vsub.bf16 %v1338_v24, %v1354_v22  ;;  %v1465_v14 = vmul.bf16 %v3102_v45, %v1385_v6  ;;  %v1357_v45 = vmul.bf16 %v3118_v43, %v2984_v53 }
 0x154   : > { %v1510_v3 = vadd.f32 %v1509_v34, %v1479_v17  ;;  %v3271_v34 = vld [vmem:[#allocation21_spill] sm:$0xff]  ;;  %v1488_v17 = vunpack.c.h.bf16 %v1463_v0 }
 0x155   : > { %v1355_v61 = vmul.bf16 %v3118_v43, %v3271_v34  ;;  %v1386_v54 = vmul.bf16 %v1370_v19, %v1370_v19  ;;  %v1373_v35 = vsub.bf16 %v1341_v48, %v1357_v45 }
 0x156   : > { %v1511_v57 = vadd.f32 %v1510_v3, %v1480_v46  ;;  %v1340_v46 = vmul.bf16 %v3116_v2, %v2942_v49  ;;  %v1489_v3 = vunpack.c.l.bf16 %v1464_v55 }
 0x157   : > { %v1371_v32 = vsub.bf16 %v1339_v40, %v1355_v61  ;;  %v1466_v7 = vmul.bf16 %v3109_v13, %v1386_v54  ;;  %v1358_v13 = vmul.bf16 %v3118_v43, %v3008_v41 }
 0x158   : > { %v1512_v37 = vadd.f32 %v1511_v57, %v1481_v15  ;;  %v1491_v15 = vunpack.c.l.bf16 %v1465_v14  ;;  %v1372_v57 = vsub.bf16 %v1340_v46, %v1356_v31 }
 0x159   : > { %v1387_v38 = vmul.bf16 %v1371_v32, %v1371_v32  ;;  %v1493_v39 = vunpack.c.l.bf16 %v1466_v7  ;;  %v1494_v56 = vunpack.c.h.bf16 %v1466_v7  ;;  %v1374_v12 = vsub.bf16 %v1342_v26, %v1358_v13 }
 0x15a   : > { %v1513_v11 = vadd.f32 %v1512_v37, %v1482_v28  ;;  %v1492_v28 = vunpack.c.h.bf16 %v1465_v14  ;;  %v1388_v18 = vmul.bf16 %v1372_v57, %v1372_v57  ;;  %v3272_v7 = vlaneseq }
 0x15b   : > { %v1467_v52 = vmul.bf16 %v3124_v16, %v1387_v38  ;;  %v1390_v36 = vmul.bf16 %v1374_v12, %v1374_v12 }
 0x15c   : > { %v1514_v42 = vadd.f32 %v1513_v11, %v1483_v9  ;;  %v1468_v60 = vmul.bf16 %v3133_v21, %v1388_v18  ;;  %v1389_v9 = vmul.bf16 %v1373_v35, %v1373_v35 }
 0x15d   : > { %v1495_v53 = vunpack.c.l.bf16 %v1467_v52  ;;  %v1470_v41 = vmul.bf16 %v3149_v29, %v1390_v36 }
 0x15e   : > { %v1515_v63 = vadd.f32 %v1514_v42, %v1484_v59  ;;  %v1496_v59 = vunpack.c.h.bf16 %v1467_v52  ;;  %v1497_v4 = vunpack.c.l.bf16 %v1468_v60  ;;  %v1469_v44 = vmul.bf16 %v3142_v8, %v1389_v9 }
 0x15f   : > { %v1498_v16 = vunpack.c.h.bf16 %v1468_v60  ;;  %v1501_v21 = vunpack.c.l.bf16 %v1470_v41 }
 0x160   : > { %v1516_v58 = vadd.f32 %v1515_v63, %v1485_v51  ;;  %v1499_v43 = vunpack.c.l.bf16 %v1469_v44  ;;  %v1500_v22 = vunpack.c.h.bf16 %v1469_v44  ;;  %v1502_v51 = vunpack.c.h.bf16 %v1470_v41 }
 0x162   : > { %v1517_v25 = vadd.f32 %v1516_v58, %v1486_v1 }
 0x164   : > { %v1518_v50 = vadd.f32 %v1517_v25, %v1487_v23 }
 0x166   : > { %v1519_v47 = vadd.f32 %v1518_v50, %v1488_v17 }
 0x168   : > { %v1520_v10 = vadd.f32 %v1519_v47, %v1489_v3 }
 0x16a   : > { %v1521_v49 = vadd.f32 %v1520_v10, %v1490_v33 }
 0x16c   : > { %v1522_v37 = vadd.f32 %v1521_v49, %v1491_v15  ;;  %v1896_v15 = vand.u32 127, %v3272_v7 }
 0x16e   : > { %v1523_v30 = vadd.f32 %v1522_v37, %v1492_v28  ;;  %vm1898_vm13 = vcmp.eq.s32.totalorder %v1896_v15, 1  ;;  %vm1897_vm14 = vcmp.eq.s32.totalorder %v1896_v15, 0 }
 0x170   : > { %v1524_v27 = vadd.f32 %v1523_v30, %v1493_v39 }
 0x172   : > { %v1525_v11 = vadd.f32 %v1524_v27, %v1494_v56 }
 0x174   : > { %v1526_v42 = vadd.f32 %v1525_v11, %v1495_v53 }
 0x176   : > { %v1527_v2 = vadd.f32 %v1526_v42, %v1496_v59 }
 0x178   : > { %v1528_v24 = vadd.f32 %v1527_v2, %v1497_v4 }
 0x17a   : > { %v1529_v5 = vadd.f32 %v1528_v24, %v1498_v16 }
 0x17c   : > { %v1530_v62 = vadd.f32 %v1529_v5, %v1499_v43 }
 0x17e   : > { %v1531_v0 = vadd.f32 %v1530_v62, %v1500_v22 }
 0x180   : > { %v1532_v63 = vadd.f32 %v1531_v0, %v1501_v21 }
 0x182   : > { %v1533_v1 = vadd.f32 %v1532_v63, %v1502_v51 }
 0x184   : > { %1534 = vadd.xlane.f32.xlu1 %v1533_v1 }
 0x1a8   : > { %v671_v58 = vpop.xlane.xlu0 %670 }
 0x1a9   : > { %v672_v55 = vrot.slane %v671_v58, 4 }
 0x1ab   : > { %v673_v8 = vadd.f32 %v672_v55, %v671_v58 }
 0x1ad   : > { %v674_v19 = vrot.slane %v673_v8, 2 }
 0x1af   : > { %v675_v6 = vadd.f32 %v674_v19, %v673_v8 }
 0x1b1   : > { %v676_v23 = vrot.slane %v675_v6, 1 }
 0x1b3   : > { %v677_v20 = vadd.f32 %v676_v23, %v675_v6 }
 0x1b5   : > { %2223 = vpush %v677_v20 }
 0x1e6   : > { %s2224_s26 = spop %2223 }
 0x1e7   : > { %v1901_v38 = vstv %s2224_s26 }
 0x1e9   : > { %v1677_v29 = vpop.f32.mrb[0].mxu1 }
 0x1ea   : > { %v2174_v40 = vpop.f32.mrb[1].mxu1 }
 0x1eb   : > { %v1680_v34 = vpop.f32.mrb[2].mxu1 }
 0x1ec   : > { %v2175_v61 = vpop.f32.mrb[3].mxu1 }
 0x207   : > { %v1886_v25 = vpop.f32.mrb[0].mxu0 }
 0x208   : > { %v2214_v17 = vpop.f32.mrb[1].mxu0  ;;  %v2216_v50 = vadd.f32 %v1886_v25, %v1677_v29 }
 0x209   : > { %v1889_v54 = vpop.f32.mrb[2].mxu0 }
 0x20a   : > { %1893 = vst [vmem:[%s652_s14] sm:$0x3] %v2216_v50  ;;  %1894 = vst [vmem:[%s656_s17 - $0x2] sm:$0xc] %v2216_v50  ;;  %v2215_v14 = vpop.f32.mrb[3].mxu0 }
 0x211   : > { %v1535_v46 = vpop.xlane.xlu1 %1534 }
 0x212   : > { %v1536_v31 = vrot.slane %v1535_v46, 4 }
 0x214   : > { %v1537_v3 = vadd.f32 %v1536_v31, %v1535_v46 }
 0x216   : > { %v1538_v32 = vrot.slane %v1537_v3, 2 }
 0x218   : > { %v1539_v47 = vadd.f32 %v1538_v32, %v1537_v3 }
 0x21a   : > { %v1540_v33 = vrot.slane %v1539_v47, 1 }
 0x21c   : > { %v1541_v10 = vadd.f32 %v1540_v33, %v1539_v47 }
 0x21e   : > { %2225 = vpush %v1541_v10 }
 0x24f   : > { %s2226_s18 = spop %2225 }
 0x250   : > { %v1899_v57 = vstv %s2226_s18 }
 0x251   : > { %v1900_v48 = vsel %vm1898_vm13, %v1899_v57, 0.0 }
 0x252   : > { %v1902_v45 = vsel %vm1897_vm14, %v1901_v38, %v1900_v48 }
 0x253   : > { %1903 = vst [vmem:[%s648_s21] sm:$0x1] %v1902_v45 }
 0x254 PF: > { %p15_p9 = scmp.ge.s32.totalorder %s2380_s28, 4   ;;  %s3273_s24 = smov %s2314_s25 }
 0x255   : > { %s3274_s25 = smov %s2389_s8  ;;  %s3275_s26 = smov %s2380_s28 }
 0x256   :  { %17 = sbr.rel (!%p15_p9) target bundleno = 2 (0x2), region = 240 }

</bundles_post_ra>
